<compile_context>
chip_gen: v7x
topology: tpu7x:2x2x1
jax: 0.10.0
libtpu: 0.0.40
codegen_flags: <defaults>
</compile_context>

<pallas_src>
import functools

import numpy as np
import jax
import jax.numpy as jnp
from jax import lax
from jax.experimental import pallas as pl
from jax.experimental.pallas import tpu as pltpu

EPS = 1e-5                      # torch.nn.LayerNorm default eps
VMEM_LIMIT = 32 * 1024 * 1024   # scoped-VMEM limit, safe on v5e / v6e / v7x


# ----------------------------- in-kernel helpers -----------------------------

def _layernorm(x, g, b):
    mu = jnp.mean(x, axis=-1, keepdims=True)
    var = jnp.mean((x - mu) ** 2, axis=-1, keepdims=True)
    return (x - mu) * lax.rsqrt(var + EPS) * g + b


def _gelu(x, exact):
    if exact:
        # exact GELU, matches torch.nn.GELU default
        return 0.5 * x * (1.0 + lax.erf(x * 0.7071067811865476))
    # TODO(synk): erf not lowerable on this backend; tanh-approx GELU differs ~1e-3 from torch.
    return jax.nn.gelu(x, approximate=True)


_ERF_STATE = {"ok": None}


def _erf_supported():
    """Probe (once) whether lax.erf lowers inside a Pallas TPU kernel on this backend."""
    if _ERF_STATE["ok"] is None:
        try:
            def k(x_ref, o_ref):
                o_ref[...] = lax.erf(x_ref[...])
            f = pl.pallas_call(k, out_shape=jax.ShapeDtypeStruct((8, 128), jnp.float32))
            jax.block_until_ready(f(jnp.zeros((8, 128), jnp.float32)))
            _ERF_STATE["ok"] = True
        except Exception:
            _ERF_STATE["ok"] = False
    return _ERF_STATE["ok"]


# ----------------------------- Pallas kernels --------------------------------

def window_attn_kernel(x_ref, g1_ref, b1_ref, wqkv_ref, bqkv_ref, wp_ref, bp_ref,
                       rpb_ref, *rest, num_heads, ws, has_mask):
    """Fused LayerNorm(norm1) + window partition + W-MSA + proj + first residual.

    x_ref:    (rb*ws, W, C)  one band of image rows (pre-norm activation == shortcut)
    wqkv_ref: (C, 3C) bf16   fused q|k|v projection (qk scale pre-folded into the q columns)
    wp_ref:   (C, C)  bf16   output projection (rows in concat-of-heads order)
    rpb_ref:  (nh, N, N)     relative-position bias
    mask_ref: (wb, N, N) bf16 (only when has_mask)  shift mask for this band's windows
    o_ref:    (rb*ws, W, C)  y = x + attn, back in image layout
    """
    if has_mask:
        mask_ref, o_ref = rest
    else:
        (o_ref,) = rest

    rows, Wf, C = x_ref.shape
    rb = rows // ws
    nwr = Wf // ws
    wb = rb * nwr
    n = ws * ws
    nh = num_heads
    hd = C // nh

    x = x_ref[...].astype(jnp.float32)                                   # (rows, W, C)
    # in-VMEM window partition (replaces the XLA window_partition HBM pass)
    xw = (x.reshape(rb, ws, nwr, ws, C).transpose(0, 2, 1, 3, 4)
           .reshape(wb * n, C))                                           # (wb*n, C)

    xn = _layernorm(xw, g1_ref[...], b1_ref[...])
    qkv = jnp.dot(xn.astype(jnp.bfloat16), wqkv_ref[...],
                  preferred_element_type=jnp.float32) + bqkv_ref[...]     # (wb*n, 3C)

    rpb = rpb_ref[...].astype(jnp.float32)                                # (nh, n, n)
    if has_mask:
        mask = mask_ref[...].astype(jnp.float32)                          # (wb, n, n)

    acc = jnp.zeros((wb * n, C), jnp.float32)
    # NOTE: per-head unrolled loop (lane slices avoid a minor-dim-splitting reshape); the output
    # projection is accumulated per head so no sub-128-lane scratch stores are emitted.  For
    # stages with 12-24 heads a batched (window*head) einsum would shrink code size further.
    for h in range(nh):
        q = qkv[:, h * hd:(h + 1) * hd].reshape(wb, n, hd)                # scale already folded
        k = qkv[:, C + h * hd:C + (h + 1) * hd].reshape(wb, n, hd)
        v = qkv[:, 2 * C + h * hd:2 * C + (h + 1) * hd].reshape(wb, n, hd)

        s = jnp.einsum('wnd,wmd->wnm', q.astype(jnp.bfloat16), k.astype(jnp.bfloat16),
                       preferred_element_type=jnp.float32) + rpb[h]       # (wb, n, n)
        if has_mask:
            s = s + mask
        s = s - jnp.max(s, axis=-1, keepdims=True)
        p = jnp.exp(s)
        p = p * pl.reciprocal(jnp.sum(p, axis=-1, keepdims=True), approx=True)

        oh = jnp.einsum('wnm,wmd->wnd', p.astype(jnp.bfloat16), v.astype(jnp.bfloat16),
                        preferred_element_type=jnp.float32)               # (wb, n, hd)
        acc = acc + jnp.dot(oh.reshape(wb * n, hd).astype(jnp.bfloat16),
                            wp_ref[pl.ds(h * hd, hd), :],
                            preferred_element_type=jnp.float32)           # (wb*n, C)

    y = xw + acc + bp_ref[...]          # fused first residual (shortcut == pre-norm x)
    # in-VMEM window reverse back to the (rows, W, C) image layout
    o = (y.reshape(rb, nwr, ws, ws, C).transpose(0, 2, 1, 3, 4)
          .reshape(rows, Wf, C))
    o_ref[...] = o.astype(o_ref.dtype)


def mlp_residual_kernel(y_ref, g2_ref, b2_ref, w1_ref, bm1_ref, w2_ref, bm2_ref, o_ref,
                        *, exact_gelu):
    """out = y + fc2(GELU(fc1(LayerNorm(y)))).  One token tile; weights resident."""
    y = y_ref[...].astype(jnp.float32)                                    # (tile_t, C)
    xn = _layernorm(y, g2_ref[...], b2_ref[...])
    h = _gelu(jnp.dot(xn.astype(jnp.bfloat16), w1_ref[...],
                      preferred_element_type=jnp.float32) + bm1_ref[...], exact_gelu)
    out = y + jnp.dot(h.astype(jnp.bfloat16), w2_ref[...],
                      preferred_element_type=jnp.float32) + bm2_ref[...]
    o_ref[...] = out.astype(o_ref.dtype)


# ----------------------------- host-side layout helpers ----------------------

def window_partition(x, ws):            # used only by the pure-JAX reference
    B, H, W, C = x.shape
    x = x.reshape(B, H // ws, ws, W // ws, ws, C)
    return x.transpose(0, 1, 3, 2, 4, 5).reshape(-1, ws, ws, C)


def window_reverse(windows, ws, H, W):  # used only by the pure-JAX reference
    B = windows.shape[0] // (H * W // ws // ws)
    x = windows.reshape(B, H // ws, W // ws, ws, ws, -1)
    return x.transpose(0, 1, 3, 2, 4, 5).reshape(B, H, W, -1)


def relative_position_index(ws):
    coords = np.stack(np.meshgrid(np.arange(ws), np.arange(ws), indexing="ij"))
    coords_flat = coords.reshape(2, -1)
    rel = coords_flat[:, :, None] - coords_flat[:, None, :]
    rel = rel.transpose(1, 2, 0).astype(np.int64)
    rel[:, :, 0] += ws - 1
    rel[:, :, 1] += ws - 1
    rel[:, :, 0] *= 2 * ws - 1
    return rel.sum(-1)                                                    # (N, N)


def compute_attn_mask(H, W, ws, shift):
    img_mask = np.zeros((1, H, W, 1), np.float32)
    h_slices = (slice(0, -ws), slice(-ws, -shift), slice(-shift, None))
    w_slices = (slice(0, -ws), slice(-ws, -shift), slice(-shift, None))
    cnt = 0
    for hs in h_slices:
        for wsl in w_slices:
            img_mask[:, hs, wsl, :] = cnt
            cnt += 1
    mw = img_mask.reshape(1, H // ws, ws, W // ws, ws, 1)
    mw = mw.transpose(0, 1, 3, 2, 4, 5).reshape(-1, ws * ws)
    am = mw[:, None, :] - mw[:, :, None]
    return np.where(am != 0, np.float32(-100.0), np.float32(0.0)).astype(np.float32)


# ----------------------------- block-size heuristics --------------------------

def _choose_row_bands(n_rb_total, ws, W, C, nh,
                      target_rows=1024, vmem_budget=20 * 1024 * 1024):
    """ws-tall row bands per attention grid step: ~1024 tokens/step, VMEM-bounded,
    preferring >=2 steps along this axis (dual-TC sharding on v7x)."""
    n = ws * ws
    nwr = W // ws

    def fits(rb):
        rows = rb * ws * W
        wb = rb * nwr
        est = (6 * rows * C * 4       # in/out blocks (dbl-buffered) + xw + acc (f32)
               + rows * 3 * C * 4     # qkv f32
               + 3 * wb * n * n * 4   # score / prob temporaries
               + 4 * C * C * 2 * 2    # bf16 qkv+proj weights, dbl-buffered
               + nh * n * n * 4 * 2   # rel-pos bias
               + wb * n * n * 2 * 2)  # shift mask (bf16)
        return rows <= target_rows and est <= vmem_budget

    divisors = [d for d in range(1, n_rb_total + 1) if n_rb_total % d == 0 and fits(d)]
    if not divisors:
        return 1
    pref = [d for d in divisors if n_rb_total // d >= 2]
    return max(pref) if pref else max(divisors)


def _choose_token_tile(T, C, hidden, vmem_budget=24 * 1024 * 1024):
    """Token tile for the MLP kernel: largest tile within budget, preferring >=2 grid steps.
    Resident bf16 weights are budgeted separately (they do not scale with the tile)."""
    w_bytes = 2 * 2 * C * hidden * 2              # fc1 + fc2 bf16, double-buffered
    budget = max(vmem_budget - w_bytes, 2 * 1024 * 1024)
    best = None
    for t in (512, 256, 128, 64, 32, 16, 8):
        if T % t:
            continue
        est = 16 * t * C + 8 * t * hidden         # in/out f32 blocks + GELU intermediates
        if est > budget:
            continue
        if best is None:
            best = t
        if T // t >= 2:
            return t
    return best if best is not None else T


# ----------------------------- parameter init --------------------------------

def init_block_params(key, dim, num_heads, window_size, mlp_ratio):
    """Parameters for one SwinTransformerBlock (qkv_bias=True, drop=0).

    NOTE: the qk scale (head_dim ** -0.5) is pre-folded into the q columns of wqkv/bqkv; when
    porting torch checkpoints apply the same one-time fold (and do NOT scale again).  wqkv
    columns are [q | k | v], each head-major; wp rows are the matching concat-of-heads order.
    """
    hidden = int(dim * mlp_ratio)
    hd = dim // num_heads
    scale = float(hd) ** -0.5
    std = 0.02
    ks = jax.random.split(key, 5)
    f32 = jnp.float32

    wqkv = jax.random.normal(ks[0], (dim, 3 * dim), f32) * std
    bqkv = jnp.zeros((1, 3 * dim), f32)
    col_scale = jnp.concatenate([jnp.full((dim,), scale, f32), jnp.ones((2 * dim,), f32)])
    wqkv = wqkv * col_scale[None, :]
    bqkv = bqkv * col_scale[None, :]

    return dict(
        g1=jnp.ones((1, dim), f32), b1=jnp.zeros((1, dim), f32),
        wqkv=wqkv.astype(jnp.bfloat16), bqkv=bqkv,
        wp=(jax.random.normal(ks[1], (dim, dim), f32) * std).astype(jnp.bfloat16),
        bp=jnp.zeros((1, dim), f32),
        rpb=jax.random.normal(ks[2], ((2 * window_size - 1) ** 2, num_heads), f32) * std,
        g2=jnp.ones((1, dim), f32), b2=jnp.zeros((1, dim), f32),
        w1=(jax.random.normal(ks[3], (dim, hidden), f32) * std).astype(jnp.bfloat16),
        bm1=jnp.zeros((1, hidden), f32),
        w2=(jax.random.normal(ks[4], (hidden, dim), f32) * std).astype(jnp.bfloat16),
        bm2=jnp.zeros((1, dim), f32),
    )


# ----------------------------- block / layer forward --------------------------

def swin_block_forward(x, p, H, W, ws, shift, num_heads, rpi, exact_gelu):
    B, L, C = x.shape
    assert L == H * W and H % ws == 0 and W % ws == 0
    n = ws * ws
    nh = num_heads
    nwr = W // ws
    n_rb_total = H // ws
    nW = n_rb_total * nwr

    # relative position bias (nh, n, n), shared by every window
    rel_bias = jnp.take(p["rpb"], jnp.asarray(rpi.reshape(-1).astype(np.int32)), axis=0)
    rel_bias = rel_bias.reshape(n, n, nh).transpose(2, 0, 1)

    xi = x.reshape(B, H, W, C)
    if shift > 0:
        # TODO(synk): the cyclic roll (and the inverse roll below) stay as XLA ops.
        xi = jnp.roll(xi, shift=(-shift, -shift), axis=(1, 2))

    rb = _choose_row_bands(n_rb_total, ws, W, C, nh)
    n_rb = n_rb_total // rb
    rows = rb * ws
    wb = rb * nwr

    in_specs = [
        pl.BlockSpec((pl.Squeezed(), rows, W, C), lambda b, r: (b, r, 0, 0)),  # x row band
        pl.BlockSpec((1, C), lambda b, r: (0, 0)),              # g1
        pl.BlockSpec((1, C), lambda b, r: (0, 0)),              # b1
        pl.BlockSpec((C, 3 * C), lambda b, r: (0, 0)),          # wqkv (bf16, resident)
        pl.BlockSpec((1, 3 * C), lambda b, r: (0, 0)),          # bqkv
        pl.BlockSpec((C, C), lambda b, r: (0, 0)),              # wp (bf16, resident)
        pl.BlockSpec((1, C), lambda b, r: (0, 0)),              # bp
        pl.BlockSpec((nh, n, n), lambda b, r: (0, 0, 0)),       # rel-pos bias (resident)
    ]
    inputs = [xi, p["g1"], p["b1"], p["wqkv"], p["bqkv"], p["wp"], p["bp"], rel_bias]
    has_mask = shift > 0
    if has_mask:
        # batch-deduplicated (nW, n, n) bf16 mask, indexed only by the row-band grid axis
        mask = jnp.asarray(compute_attn_mask(H, W, ws, shift)).astype(jnp.bfloat16)
        in_specs.append(pl.BlockSpec((wb, n, n), lambda b, r: (r, 0, 0)))
        inputs.append(mask)

    tok = B * H * W
    attn_flops = int(tok * (8 * C * C + 4 * n * C))
    attn_trans = int(tok * nh * n)
    attn_bytes = int(2 * tok * C * 4 + 8 * C * C + nh * n * n * 4
                     + (nW * n * n * 2 if has_mask else 0))

    y = pl.pallas_call(
        functools.partial(window_attn_kernel, num_heads=nh, ws=ws, has_mask=has_mask),
        out_shape=jax.ShapeDtypeStruct((B, H, W, C), x.dtype),
        grid=(B, n_rb),
        in_specs=in_specs,
        out_specs=pl.BlockSpec((pl.Squeezed(), rows, W, C), lambda b, r: (b, r, 0, 0)),
        compiler_params=pltpu.CompilerParams(
            dimension_semantics=("parallel", "parallel"),
            vmem_limit_bytes=VMEM_LIMIT),
        cost_estimate=pl.CostEstimate(flops=attn_flops, transcendentals=attn_trans,
                                      bytes_accessed=attn_bytes),
    )(*inputs)

    if shift > 0:
        y = jnp.roll(y, shift=(shift, shift), axis=(1, 2))

    # fused norm2 + Mlp + residual, tiled over tokens (y already contains the first residual)
    T = B * L
    hidden = p["w1"].shape[1]
    tile_t = _choose_token_tile(T, C, hidden)
    mlp_flops = int(4 * T * C * hidden)
    mlp_trans = int(T * hidden)
    mlp_bytes = int(2 * T * C * 4 + 4 * C * hidden)

    out = pl.pallas_call(
        functools.partial(mlp_residual_kernel, exact_gelu=exact_gelu),
        out_shape=jax.ShapeDtypeStruct((T, C), x.dtype),
        grid=(T // tile_t,),
        in_specs=[
            pl.BlockSpec((tile_t, C), lambda i: (i, 0)),         # y tile
            pl.BlockSpec((1, C), lambda i: (0, 0)),              # g2
            pl.BlockSpec((1, C), lambda i: (0, 0)),              # b2
            pl.BlockSpec((C, hidden), lambda i: (0, 0)),         # w1 (bf16, resident)
            pl.BlockSpec((1, hidden), lambda i: (0, 0)),         # bm1
            pl.BlockSpec((hidden, C), lambda i: (0, 0)),         # w2 (bf16, resident)
            pl.BlockSpec((1, C), lambda i: (0, 0)),              # bm2
        ],
        out_specs=pl.BlockSpec((tile_t, C), lambda i: (i, 0)),
        compiler_params=pltpu.CompilerParams(
            dimension_semantics=("parallel",),
            vmem_limit_bytes=VMEM_LIMIT),
        cost_estimate=pl.CostEstimate(flops=mlp_flops, transcendentals=mlp_trans,
                                      bytes_accessed=mlp_bytes),
    )(y.reshape(T, C), p["g2"], p["b2"], p["w1"], p["bm1"], p["w2"], p["bm2"])

    return out.reshape(B, L, C)


def basic_layer_forward(x, blocks_params, input_resolution, window_size, num_heads):
    H, W = input_resolution
    ws = window_size
    force_no_shift = False
    if min(input_resolution) <= ws:
        ws = min(input_resolution)
        force_no_shift = True
    rpi = relative_position_index(ws)
    exact_gelu = _erf_supported()
    for i, p in enumerate(blocks_params):
        shift = 0 if (i % 2 == 0 or force_no_shift) else ws // 2
        x = swin_block_forward(x, p, H, W, ws, shift, num_heads, rpi, exact_gelu)
    # downsample is None in this configuration
    return x


# ----------------------------- pure-JAX f32 reference -------------------------

def reference_block(x, p, H, W, ws, shift, num_heads, rpi):
    B, L, C = x.shape
    n = ws * ws
    nh = num_heads
    hd = C // nh
    rel = jnp.take(p["rpb"], jnp.asarray(rpi.reshape(-1).astype(np.int32)), axis=0)
    rel = rel.reshape(n, n, nh).transpose(2, 0, 1)

    shortcut = x
    xn = _layernorm(x, p["g1"], p["b1"])
    xi = xn.reshape(B, H, W, C)
    if shift > 0:
        xi = jnp.roll(xi, (-shift, -shift), axis=(1, 2))
    xw = window_partition(xi, ws).reshape(-1, n, C)
    qkv = xw @ p["wqkv"].astype(jnp.float32) + p["bqkv"]
    q = qkv[..., :C].reshape(-1, n, nh, hd).transpose(0, 2, 1, 3)
    k = qkv[..., C:2 * C].reshape(-1, n, nh, hd).transpose(0, 2, 1, 3)
    v = qkv[..., 2 * C:].reshape(-1, n, nh, hd).transpose(0, 2, 1, 3)
    s = jnp.einsum('bhnd,bhmd->bhnm', q, k) + rel[None]          # scale pre-folded into wqkv
    if shift > 0:
        mask = jnp.asarray(compute_attn_mask(H, W, ws, shift))
        nW = mask.shape[0]
        s = (s.reshape(B, nW, nh, n, n) + mask[None, :, None]).reshape(-1, nh, n, n)
    a = jax.nn.softmax(s, axis=-1)
    o = jnp.einsum('bhnm,bhmd->bhnd', a, v).transpose(0, 2, 1, 3).reshape(-1, n, C)
    o = o @ p["wp"].astype(jnp.float32) + p["bp"]
    o = window_reverse(o.reshape(-1, ws, ws, C), ws, H, W)
    if shift > 0:
        o = jnp.roll(o, (shift, shift), axis=(1, 2))
    x = shortcut + o.reshape(B, L, C)
    xn2 = _layernorm(x, p["g2"], p["b2"])
    h = jax.nn.gelu(xn2 @ p["w1"].astype(jnp.float32) + p["bm1"], approximate=False)
    return x + h @ p["w2"].astype(jnp.float32) + p["bm2"]


def reference_forward(x, blocks_params, input_resolution, window_size, num_heads):
    H, W = input_resolution
    ws = window_size
    force_no_shift = False
    if min(input_resolution) <= ws:
        ws = min(input_resolution)
        force_no_shift = True
    rpi = relative_position_index(ws)
    for i, p in enumerate(blocks_params):
        shift = 0 if (i % 2 == 0 or force_no_shift) else ws // 2
        x = reference_block(x, p, H, W, ws, shift, num_heads, rpi)
    return x


# ----------------------------- main -------------------------------------------

if __name__ == "__main__":
    B = 2
    dim = 32
    H = W = 8
    depth = 2
    num_heads = 2
    window_size = 4
    mlp_ratio = 4.0

    key = jax.random.PRNGKey(0)
    kx, kp = jax.random.split(key)
    x = jax.random.normal(kx, (B, H * W, dim), jnp.float32)

    ws_eff = min(window_size, min(H, W))   # same clamp the torch module applies
    blocks_params = [
        init_block_params(k, dim, num_heads, ws_eff, mlp_ratio)
        for k in jax.random.split(kp, depth)
    ]

    _erf_supported()   # probe once, outside any trace

    out = basic_layer_forward(x, blocks_params, (H, W), window_size, num_heads)
    out = jax.block_until_ready(out)
    assert out.shape == (B, H * W, dim)
    assert bool(jnp.all(jnp.isfinite(out)))

    # tolerance-checked against a pure-JAX f32 reference (bf16 matmuls / approx reciprocal
    # introduce ~1e-3 deviations by design)
    ref = jax.block_until_ready(
        reference_forward(x, blocks_params, (H, W), window_size, num_heads))
    assert float(jnp.max(jnp.abs(out - ref))) < 5e-2

    print("KERNEL_OK")
</pallas_src>

<mosaic_0001>
module attributes {stable_mosaic.version = 11 : i64} {
  func.func @k(%arg0: memref<8x128xf32, #tpu.memory_space<vmem>>, %arg1: memref<8x128xf32, #tpu.memory_space<vmem>>) attributes {dimension_semantics = [], scalar_prefetch = 0 : i64, scratch_operands = 0 : i64, tpu.core_type = #tpu.core_type<tc>} {
    %c0 = arith.constant 0 : index
    %c0_0 = arith.constant 0 : index
    %0 = vector.load %arg0[%c0, %c0_0] : memref<8x128xf32, #tpu.memory_space<vmem>>, vector<8x128xf32>
    %1 = math.erf %0 : vector<8x128xf32>
    %c0_1 = arith.constant 0 : index
    %c0_2 = arith.constant 0 : index
    %2 = vector.load %arg1[%c0_1, %c0_2] : memref<8x128xf32, #tpu.memory_space<vmem>>, vector<8x128xf32>
    tpu.vector_store %arg1[%c0_1, %c0_2], %1 {strides = array<i32>} : memref<8x128xf32, #tpu.memory_space<vmem>>, vector<8x128xf32>,
    return
  }
}

module attributes {stable_mosaic.version = 11 : i64} {
  func.func @window_attn_kernel(%arg0: i32, %arg1: i32, %arg2: memref<1x4x8x32xf32, #tpu.memory_space<vmem>>, %arg3: memref<1x32xf32, #tpu.memory_space<vmem>>, %arg4: memref<1x32xf32, #tpu.memory_space<vmem>>, %arg5: memref<32x96xbf16, #tpu.memory_space<vmem>>, %arg6: memref<1x96xf32, #tpu.memory_space<vmem>>, %arg7: memref<32x32xbf16, #tpu.memory_space<vmem>>, %arg8: memref<1x32xf32, #tpu.memory_space<vmem>>, %arg9: memref<2x16x16xf32, #tpu.memory_space<vmem>>, %arg10: memref<1x4x8x32xf32, #tpu.memory_space<vmem>>) attributes {dimension_semantics = [#tpu.dimension_semantics<parallel>, #tpu.dimension_semantics<parallel>], iteration_bounds = array<i64: 2, 2>, scalar_prefetch = 0 : i64, scratch_operands = 0 : i64, tpu.core_type = #tpu.core_type<tc>, window_params = [{transform_indices = @transform_0, window_bounds = array<i64: 1, 4, 8, 32>}, {pipeline_mode = #tpu.pipeline_mode<synchronous>, transform_indices = @transform_1, window_bounds = array<i64: 1, 32>}, {pipeline_mode = #tpu.pipeline_mode<synchronous>, transform_indices = @transform_2, window_bounds = array<i64: 1, 32>}, {pipeline_mode = #tpu.pipeline_mode<synchronous>, transform_indices = @transform_3, window_bounds = array<i64: 32, 96>}, {pipeline_mode = #tpu.pipeline_mode<synchronous>, transform_indices = @transform_4, window_bounds = array<i64: 1, 96>}, {pipeline_mode = #tpu.pipeline_mode<synchronous>, transform_indices = @transform_5, window_bounds = array<i64: 32, 32>}, {pipeline_mode = #tpu.pipeline_mode<synchronous>, transform_indices = @transform_6, window_bounds = array<i64: 1, 32>}, {pipeline_mode = #tpu.pipeline_mode<synchronous>, transform_indices = @transform_7, window_bounds = array<i64: 2, 16, 16>}, {transform_indices = @transform_8, window_bounds = array<i64: 1, 4, 8, 32>}]} {
    %c0 = arith.constant 0 : index
    %c0_0 = arith.constant 0 : index
    %c0_1 = arith.constant 0 : index
    %c0_2 = arith.constant 0 : index
    %0 = vector.load %arg2[%c0, %c0_0, %c0_1, %c0_2] : memref<1x4x8x32xf32, #tpu.memory_space<vmem>>, vector<1x4x8x32xf32>
    %1 = vector.shape_cast %0 : vector<1x4x8x32xf32> to vector<4x8x32xf32>
    %2 = vector.shape_cast %1 : vector<4x8x32xf32> to vector<1x4x2x4x32xf32>
    %3 = tpu.transpose %2, [0, 2, 1, 3, 4] : vector<1x4x2x4x32xf32> -> vector<1x2x4x4x32xf32>
    %4 = vector.shape_cast %3 : vector<1x2x4x4x32xf32> to vector<32x32xf32>
    %c0_3 = arith.constant 0 : index
    %c0_4 = arith.constant 0 : index
    %5 = vector.load %arg3[%c0_3, %c0_4] : memref<1x32xf32, #tpu.memory_space<vmem>>, vector<1x32xf32>
    %c0_5 = arith.constant 0 : index
    %c0_6 = arith.constant 0 : index
    %6 = vector.load %arg4[%c0_5, %c0_6] : memref<1x32xf32, #tpu.memory_space<vmem>>, vector<1x32xf32>
    %cst = arith.constant dense<0.000000e+00> : vector<32xf32>
    %7 = vector.multi_reduction <add>, %4, %cst [1] : vector<32x32xf32> to vector<32xf32>
    %8 = vector.shape_cast %7 : vector<32xf32> to vector<32x1xf32>
    %cst_7 = arith.constant 3.200000e+01 : f32
    %9 = vector.broadcast %cst_7 : f32 to vector<32x1xf32>
    %10 = arith.divf %8, %9 : vector<32x1xf32>
    %11 = vector.broadcast %10 : vector<32x1xf32> to vector<32x32xf32>
    %12 = arith.subf %4, %11 : vector<32x32xf32>
    %13 = arith.mulf %12, %12 : vector<32x32xf32>
    %cst_8 = arith.constant dense<0.000000e+00> : vector<32xf32>
    %14 = vector.multi_reduction <add>, %13, %cst_8 [1] : vector<32x32xf32> to vector<32xf32>
    %15 = vector.shape_cast %14 : vector<32xf32> to vector<32x1xf32>
    %cst_9 = arith.constant 3.200000e+01 : f32
    %16 = vector.broadcast %cst_9 : f32 to vector<32x1xf32>
    %17 = arith.divf %15, %16 : vector<32x1xf32>
    %18 = vector.broadcast %10 : vector<32x1xf32> to vector<32x32xf32>
    %19 = arith.subf %4, %18 : vector<32x32xf32>
    %cst_10 = arith.constant 9.99999974E-6 : f32
    %20 = vector.broadcast %cst_10 : f32 to vector<32x1xf32>
    %21 = arith.addf %17, %20 : vector<32x1xf32>
    %22 = math.rsqrt %21 : vector<32x1xf32>
    %23 = vector.broadcast %22 : vector<32x1xf32> to vector<32x32xf32>
    %24 = arith.mulf %19, %23 : vector<32x32xf32>
    %25 = vector.broadcast %5 : vector<1x32xf32> to vector<32x32xf32>
    %26 = arith.mulf %24, %25 : vector<32x32xf32>
    %27 = vector.broadcast %6 : vector<1x32xf32> to vector<32x32xf32>
    %28 = arith.addf %26, %27 : vector<32x32xf32>
    %29 = arith.truncf %28 : vector<32x32xf32> to vector<32x32xbf16>
    %c0_11 = arith.constant 0 : index
    %c0_12 = arith.constant 0 : index
    %30 = vector.load %arg5[%c0_11, %c0_12] : memref<32x96xbf16, #tpu.memory_space<vmem>>, vector<32x96xbf16>
    %cst_13 = arith.constant dense<0.000000e+00> : vector<32x96xf32>
    %31 = tpu.matmul %29, %30, %cst_13 {dimension_numbers = #tpu.dot_dimension_numbers<[1], [0], [0], [1], [0, 0, 1, 1], [], []>} : vector<32x32xbf16>, vector<32x96xbf16>, vector<32x96xf32> -> vector<32x96xf32>
    %c0_14 = arith.constant 0 : index
    %c0_15 = arith.constant 0 : index
    %32 = vector.load %arg6[%c0_14, %c0_15] : memref<1x96xf32, #tpu.memory_space<vmem>>, vector<1x96xf32>
    %33 = vector.broadcast %32 : vector<1x96xf32> to vector<32x96xf32>
    %34 = arith.addf %31, %33 : vector<32x96xf32>
    %c0_16 = arith.constant 0 : index
    %c0_17 = arith.constant 0 : index
    %c0_18 = arith.constant 0 : index
    %35 = vector.load %arg9[%c0_16, %c0_17, %c0_18] : memref<2x16x16xf32, #tpu.memory_space<vmem>>, vector<2x16x16xf32>
    %cst_19 = arith.constant 0.000000e+00 : f32
    %36 = vector.broadcast %cst_19 : f32 to vector<32x32xf32>
    %37 = vector.extract_strided_slice %34 {offsets = [0, 0], sizes = [32, 16], strides = [1, 1]} : vector<32x96xf32> to vector<32x16xf32>
    %38 = vector.shape_cast %37 : vector<32x16xf32> to vector<2x16x16xf32>
    %39 = vector.extract_strided_slice %34 {offsets = [0, 32], sizes = [32, 16], strides = [1, 1]} : vector<32x96xf32> to vector<32x16xf32>
    %40 = vector.shape_cast %39 : vector<32x16xf32> to vector<2x16x16xf32>
    %41 = vector.extract_strided_slice %34 {offsets = [0, 64], sizes = [32, 16], strides = [1, 1]} : vector<32x96xf32> to vector<32x16xf32>
    %42 = vector.shape_cast %41 : vector<32x16xf32> to vector<2x16x16xf32>
    %43 = arith.truncf %38 : vector<2x16x16xf32> to vector<2x16x16xbf16>
    %44 = arith.truncf %40 : vector<2x16x16xf32> to vector<2x16x16xbf16>
    "tpu.trace_start"() <{level = 10 : i32, message = "wnd,wmd->wnm"}> : () -> ()
    %cst_20 = arith.constant dense<0.000000e+00> : vector<2x16x16xf32>
    %45 = tpu.matmul %43, %44, %cst_20 {dimension_numbers = #tpu.dot_dimension_numbers<[2], [2], [1], [1], [0, 0, 0, 1, 1, 1], [0], [0]>} : vector<2x16x16xbf16>, vector<2x16x16xbf16>, vector<2x16x16xf32> -> vector<2x16x16xf32>
    "tpu.trace_stop"() : () -> ()
    %46 = vector.extract_strided_slice %35 {offsets = [0, 0, 0], sizes = [1, 16, 16], strides = [1, 1, 1]} : vector<2x16x16xf32> to vector<1x16x16xf32>
    %47 = vector.shape_cast %46 : vector<1x16x16xf32> to vector<16x16xf32>
    %48 = vector.shape_cast %47 : vector<16x16xf32> to vector<1x16x16xf32>
    %49 = vector.broadcast %48 : vector<1x16x16xf32> to vector<2x16x16xf32>
    %50 = arith.addf %45, %49 : vector<2x16x16xf32>
    %cst_21 = arith.constant dense<0xFF800000> : vector<2x16xf32>
    %51 = vector.multi_reduction <maximumf>, %50, %cst_21 [2] : vector<2x16x16xf32> to vector<2x16xf32>
    %52 = vector.shape_cast %51 : vector<2x16xf32> to vector<2x16x1xf32>
    %53 = vector.broadcast %52 : vector<2x16x1xf32> to vector<2x16x16xf32>
    %54 = arith.subf %50, %53 : vector<2x16x16xf32>
    %55 = math.exp %54 : vector<2x16x16xf32>
    %cst_22 = arith.constant dense<0.000000e+00> : vector<2x16xf32>
    %56 = vector.multi_reduction <add>, %55, %cst_22 [2] : vector<2x16x16xf32> to vector<2x16xf32>
    %57 = vector.shape_cast %56 : vector<2x16xf32> to vector<2x16x1xf32>
    %58 = tpu.reciprocal %57 {approx = true} : vector<2x16x1xf32> -> vector<2x16x1xf32>
    %59 = vector.broadcast %58 : vector<2x16x1xf32> to vector<2x16x16xf32>
    %60 = arith.mulf %55, %59 : vector<2x16x16xf32>
    %61 = arith.truncf %60 : vector<2x16x16xf32> to vector<2x16x16xbf16>
    %62 = arith.truncf %42 : vector<2x16x16xf32> to vector<2x16x16xbf16>
    "tpu.trace_start"() <{level = 10 : i32, message = "wnm,wmd->wnd"}> : () -> ()
    %cst_23 = arith.constant dense<0.000000e+00> : vector<2x16x16xf32>
    %63 = tpu.matmul %61, %62, %cst_23 {dimension_numbers = #tpu.dot_dimension_numbers<[2], [1], [1], [2], [0, 0, 0, 1, 1, 2], [0], [0]>} : vector<2x16x16xbf16>, vector<2x16x16xbf16>, vector<2x16x16xf32> -> vector<2x16x16xf32>
    "tpu.trace_stop"() : () -> ()
    %64 = vector.shape_cast %63 : vector<2x16x16xf32> to vector<32x16xf32>
    %65 = arith.truncf %64 : vector<32x16xf32> to vector<32x16xbf16>
    %c0_24 = arith.constant 0 : index
    %c0_25 = arith.constant 0 : index
    %66 = vector.load %arg7[%c0_24, %c0_25] : memref<32x32xbf16, #tpu.memory_space<vmem>>, vector<16x32xbf16>
    %cst_26 = arith.constant dense<0.000000e+00> : vector<32x32xf32>
    %67 = tpu.matmul %65, %66, %cst_26 {dimension_numbers = #tpu.dot_dimension_numbers<[1], [0], [0], [1], [0, 0, 1, 1], [], []>} : vector<32x16xbf16>, vector<16x32xbf16>, vector<32x32xf32> -> vector<32x32xf32>
    %68 = arith.addf %36, %67 : vector<32x32xf32>
    %69 = vector.extract_strided_slice %34 {offsets = [0, 16], sizes = [32, 16], strides = [1, 1]} : vector<32x96xf32> to vector<32x16xf32>
    %70 = vector.shape_cast %69 : vector<32x16xf32> to vector<2x16x16xf32>
    %71 = vector.extract_strided_slice %34 {offsets = [0, 48], sizes = [32, 16], strides = [1, 1]} : vector<32x96xf32> to vector<32x16xf32>
    %72 = vector.shape_cast %71 : vector<32x16xf32> to vector<2x16x16xf32>
    %73 = vector.extract_strided_slice %34 {offsets = [0, 80], sizes = [32, 16], strides = [1, 1]} : vector<32x96xf32> to vector<32x16xf32>
    %74 = vector.shape_cast %73 : vector<32x16xf32> to vector<2x16x16xf32>
    %75 = arith.truncf %70 : vector<2x16x16xf32> to vector<2x16x16xbf16>
    %76 = arith.truncf %72 : vector<2x16x16xf32> to vector<2x16x16xbf16>
    "tpu.trace_start"() <{level = 10 : i32, message = "wnd,wmd->wnm"}> : () -> ()
    %cst_27 = arith.constant dense<0.000000e+00> : vector<2x16x16xf32>
    %77 = tpu.matmul %75, %76, %cst_27 {dimension_numbers = #tpu.dot_dimension_numbers<[2], [2], [1], [1], [0, 0, 0, 1, 1, 1], [0], [0]>} : vector<2x16x16xbf16>, vector<2x16x16xbf16>, vector<2x16x16xf32> -> vector<2x16x16xf32>
    "tpu.trace_stop"() : () -> ()
    %78 = vector.extract_strided_slice %35 {offsets = [1, 0, 0], sizes = [1, 16, 16], strides = [1, 1, 1]} : vector<2x16x16xf32> to vector<1x16x16xf32>
    %79 = vector.shape_cast %78 : vector<1x16x16xf32> to vector<16x16xf32>
    %80 = vector.shape_cast %79 : vector<16x16xf32> to vector<1x16x16xf32>
    %81 = vector.broadcast %80 : vector<1x16x16xf32> to vector<2x16x16xf32>
    %82 = arith.addf %77, %81 : vector<2x16x16xf32>
    %cst_28 = arith.constant dense<0xFF800000> : vector<2x16xf32>
    %83 = vector.multi_reduction <maximumf>, %82, %cst_28 [2] : vector<2x16x16xf32> to vector<2x16xf32>
    %84 = vector.shape_cast %83 : vector<2x16xf32> to vector<2x16x1xf32>
    %85 = vector.broadcast %84 : vector<2x16x1xf32> to vector<2x16x16xf32>
    %86 = arith.subf %82, %85 : vector<2x16x16xf32>
    %87 = math.exp %86 : vector<2x16x16xf32>
    %cst_29 = arith.constant dense<0.000000e+00> : vector<2x16xf32>
    %88 = vector.multi_reduction <add>, %87, %cst_29 [2] : vector<2x16x16xf32> to vector<2x16xf32>
    %89 = vector.shape_cast %88 : vector<2x16xf32> to vector<2x16x1xf32>
    %90 = tpu.reciprocal %89 {approx = true} : vector<2x16x1xf32> -> vector<2x16x1xf32>
    %91 = vector.broadcast %90 : vector<2x16x1xf32> to vector<2x16x16xf32>
    %92 = arith.mulf %87, %91 : vector<2x16x16xf32>
    %93 = arith.truncf %92 : vector<2x16x16xf32> to vector<2x16x16xbf16>
    %94 = arith.truncf %74 : vector<2x16x16xf32> to vector<2x16x16xbf16>
    "tpu.trace_start"() <{level = 10 : i32, message = "wnm,wmd->wnd"}> : () -> ()
    %cst_30 = arith.constant dense<0.000000e+00> : vector<2x16x16xf32>
    %95 = tpu.matmul %93, %94, %cst_30 {dimension_numbers = #tpu.dot_dimension_numbers<[2], [1], [1], [2], [0, 0, 0, 1, 1, 2], [0], [0]>} : vector<2x16x16xbf16>, vector<2x16x16xbf16>, vector<2x16x16xf32> -> vector<2x16x16xf32>
    "tpu.trace_stop"() : () -> ()
    %96 = vector.shape_cast %95 : vector<2x16x16xf32> to vector<32x16xf32>
    %97 = arith.truncf %96 : vector<32x16xf32> to vector<32x16xbf16>
    %c16 = arith.constant 16 : index
    %c0_31 = arith.constant 0 : index
    %98 = vector.load %arg7[%c16, %c0_31] : memref<32x32xbf16, #tpu.memory_space<vmem>>, vector<16x32xbf16>
    %cst_32 = arith.constant dense<0.000000e+00> : vector<32x32xf32>
    %99 = tpu.matmul %97, %98, %cst_32 {dimension_numbers = #tpu.dot_dimension_numbers<[1], [0], [0], [1], [0, 0, 1, 1], [], []>} : vector<32x16xbf16>, vector<16x32xbf16>, vector<32x32xf32> -> vector<32x32xf32>
    %100 = arith.addf %68, %99 : vector<32x32xf32>
    %101 = arith.addf %4, %100 : vector<32x32xf32>
    %c0_33 = arith.constant 0 : index
    %c0_34 = arith.constant 0 : index
    %102 = vector.load %arg8[%c0_33, %c0_34] : memref<1x32xf32, #tpu.memory_space<vmem>>, vector<1x32xf32>
    %103 = vector.broadcast %102 : vector<1x32xf32> to vector<32x32xf32>
    %104 = arith.addf %101, %103 : vector<32x32xf32>
    %105 = vector.shape_cast %104 : vector<32x32xf32> to vector<1x2x4x4x32xf32>
    %106 = tpu.transpose %105, [0, 2, 1, 3, 4] : vector<1x2x4x4x32xf32> -> vector<1x4x2x4x32xf32>
    %107 = vector.shape_cast %106 : vector<1x4x2x4x32xf32> to vector<4x8x32xf32>
    %c0_35 = arith.constant 0 : index
    %c0_36 = arith.constant 0 : index
    %c0_37 = arith.constant 0 : index
    %c0_38 = arith.constant 0 : index
    %108 = vector.load %arg10[%c0_35, %c0_36, %c0_37, %c0_38] : memref<1x4x8x32xf32, #tpu.memory_space<vmem>>, vector<1x4x8x32xf32>
    %109 = vector.shape_cast %108 : vector<1x4x8x32xf32> to vector<4x8x32xf32>
    %110 = vector.shape_cast %107 : vector<4x8x32xf32> to vector<1x4x8x32xf32>
    tpu.vector_store %arg10[%c0_35, %c0_36, %c0_37, %c0_38], %110 {strides = array<i32>} : memref<1x4x8x32xf32, #tpu.memory_space<vmem>>, vector<1x4x8x32xf32>,
    return
  }
  func.func @transform_0(%arg0: i32, %arg1: i32) -> (i32, i32, i32, i32) {
    %c0_i32 = arith.constant 0 : i32
    %c0_i32_0 = arith.constant 0 : i32
    %c0_i32_1 = arith.constant 0 : i32
    return %arg0, %arg1, %c0_i32, %c0_i32_0 : i32, i32, i32, i32
  }
  func.func @transform_1(%arg0: i32, %arg1: i32) -> (i32, i32) {
    %c0_i32 = arith.constant 0 : i32
    %c0_i32_0 = arith.constant 0 : i32
    %c0_i32_1 = arith.constant 0 : i32
    return %c0_i32, %c0_i32_0 : i32, i32
  }
  func.func @transform_2(%arg0: i32, %arg1: i32) -> (i32, i32) {
    %c0_i32 = arith.constant 0 : i32
    %c0_i32_0 = arith.constant 0 : i32
    %c0_i32_1 = arith.constant 0 : i32
    return %c0_i32, %c0_i32_0 : i32, i32
  }
  func.func @transform_3(%arg0: i32, %arg1: i32) -> (i32, i32) {
    %c0_i32 = arith.constant 0 : i32
    %c0_i32_0 = arith.constant 0 : i32
    %c0_i32_1 = arith.constant 0 : i32
    return %c0_i32, %c0_i32_0 : i32, i32
  }
  func.func @transform_4(%arg0: i32, %arg1: i32) -> (i32, i32) {
    %c0_i32 = arith.constant 0 : i32
    %c0_i32_0 = arith.constant 0 : i32
    %c0_i32_1 = arith.constant 0 : i32
    return %c0_i32, %c0_i32_0 : i32, i32
  }
  func.func @transform_5(%arg0: i32, %arg1: i32) -> (i32, i32) {
    %c0_i32 = arith.constant 0 : i32
    %c0_i32_0 = arith.constant 0 : i32
    %c0_i32_1 = arith.constant 0 : i32
    return %c0_i32, %c0_i32_0 : i32, i32
  }
  func.func @transform_6(%arg0: i32, %arg1: i32) -> (i32, i32) {
    %c0_i32 = arith.constant 0 : i32
    %c0_i32_0 = arith.constant 0 : i32
    %c0_i32_1 = arith.constant 0 : i32
    return %c0_i32, %c0_i32_0 : i32, i32
  }
  func.func @transform_7(%arg0: i32, %arg1: i32) -> (i32, i32, i32) {
    %c0_i32 = arith.constant 0 : i32
    %c0_i32_0 = arith.constant 0 : i32
    %c0_i32_1 = arith.constant 0 : i32
    %c0_i32_2 = arith.constant 0 : i32
    return %c0_i32, %c0_i32_0, %c0_i32_1 : i32, i32, i32
  }
  func.func @transform_8(%arg0: i32, %arg1: i32) -> (i32, i32, i32, i32) {
    %c0_i32 = arith.constant 0 : i32
    %c0_i32_0 = arith.constant 0 : i32
    %c0_i32_1 = arith.constant 0 : i32
    return %arg0, %arg1, %c0_i32, %c0_i32_0 : i32, i32, i32, i32
  }
}

</mosaic_0001>

<bundles_post_ra>
// kernel: tpu_custom_call.1
= control target key start
LH: loop header
LB: loop body
LE: loop exit
PB: predicated region body
PF: predicated region fallthrough
CT: control target
= control target key end

     0   :  { %6 = vsyncpa [#allocation3], 0  ;;  %s127_s0 = inlined_call_operand.hbm [shape: f32[8,128], index: 0, kind: input, shape index: {}]   ;;  %s128_s1 = inlined_call_operand.hbm [shape: f32[8,128], index: 1, kind: output, shape index: {}]  }
   0x1   :  { %7 = vsyncpa [#allocation4], 0  ;;  %s91_s6 = smov [#allocation2]   ;;  %s43_s10 = scalar_lea.hbm %s127_s0, 128 }
   0x2   :  { %s14_s7 = sshll.u32 %s91_s6, 4  ;;  %p44_p0 = scmp.ne.s32.totalorder %s127_s0, %s43_s10  ;;  %s15_s7 = int_to_ptr.vmem [resolvable:$true] %s14_s7 }
   0x3   :  { %p47_p1 = scmp.lt.u32.totalorder %s43_s10, %s127_s0 }
   0x5   :  { %p49_p2 = pnand %p47_p1, %p44_p0 }
   0x7   :  { %52 = shalt.err (!%p49_p2)
}
   0x8   :  { %s53_s15 = scalar_lea.vmem %s15_s7, 128  ;;  %p58_p4 = scmp.lt.s32.totalorder %s15_s7, %s15_s7 }
   0x9   :  { %p54_p3 = scmp.ne.s32.totalorder %s15_s7, %s53_s15  ;;  %p59_p5 = scmp.lt.s32.totalorder %s53_s15, %s53_s15 }
   0xb   :  { %p60_p6 = por %p59_p5, %p58_p4 }
   0xd   :  { %p61_p7 = pnand %p60_p6, %p54_p3 }
   0xf   :  { %64 = shalt.err (!%p61_p7)
}
  0x10   :  { %17 = dma.hbm_to_vmem [thread:$0]  %s127_s0, 128, %s15_s7, [#allocation3]  }
  0x11   :  { %87 = dma.done.wait [#allocation3], 128  }
  0x12   :  { %88 = vsyncadd [#allocation3], 4294967168  ;;  %v21_v0 = vld [vmem:[#allocation2] sm:$0xff]  ;;  %s92_s18 = smov [#allocation5]  }
  0x13   :  { %41 = verf.f32 %v21_v0  ;;  %s30_s19 = sshll.u32 %s92_s18, 4  ;;  %s31_s19 = int_to_ptr.vmem [resolvable:$true] %s30_s19 }
  0x14   :  { %s65_s20 = scalar_lea.vmem %s31_s19, 128  ;;  %p70_p9 = scmp.lt.s32.totalorder %s31_s19, %s31_s19 }
  0x15   :  { %p66_p8 = scmp.ne.s32.totalorder %s31_s19, %s65_s20  ;;  %p71_p10 = scmp.lt.s32.totalorder %s65_s20, %s65_s20 }
  0x17   :  { %p72_p11 = por %p71_p10, %p70_p9 }
  0x19   :  { %p73_p12 = pnand %p72_p11, %p66_p8 }
  0x1d   :  { %v42_v1 = vpop.eup %41 }
  0x1e   :  { %23 = vst [vmem:[#allocation5] sm:$0xff] %v42_v1 }
  0x1f   :  { %76 = shalt.err (!%p73_p12)
}
  0x20   :  { %s77_s0 = scalar_lea.hbm %s128_s1, 128 }
  0x21   :  { %p78_p13 = scmp.ne.s32.totalorder %s128_s1, %s77_s0  ;;  %p81_p0 = scmp.lt.u32.totalorder %s77_s0, %s128_s1 }
  0x23   :  { %p83_p1 = pnand %p81_p0, %p78_p13 }
  0x25   :  { %86 = shalt.err (!%p83_p1)
}
  0x26   :  { %33 = dma.vmem_to_hbm [thread:$0]  %s31_s19, 128, %s128_s1, [#allocation4]  }
  0x27   :  { %89 = dma.done.wait [#allocation4], 128  }
  0x28   :  { %90 = vsyncadd [#allocation4], 4294967168 }
  0x29   :  { %37 = vsyncpa [#allocation3], 1 }
  0x2a   :  { %38 = vsyncpa [#allocation4], 1 }

// kernel: tpu_custom_call.1
= control target key start
LH: loop header
LB: loop body
LE: loop exit
PB: predicated region body
PF: predicated region fallthrough
CT: control target
= control target key end

     0   :  { %s2718_s0 = inlined_call_operand.hbm [shape: f32[2,8,8,32], index: 0, kind: input, shape index: {}]   ;;  %s2719_s1 = inlined_call_operand.vmem [shape: f32[1,32], index: 1, kind: input, shape index: {}]   ;;  %s2720_s2 = inlined_call_operand.vmem [shape: f32[1,32], index: 2, kind: input, shape index: {}]   ;;  %s2721_s3 = inlined_call_operand.hbm [shape: bf16[32,96], index: 3, kind: input, shape index: {}]   ;;  %s2722_s4 = inlined_call_operand.hbm [shape: f32[1,96], index: 4, kind: input, shape index: {}]   ;;  %s2723_s5 = inlined_call_operand.vmem [shape: bf16[32,32], index: 5, kind: input, shape index: {}]   ;;  %s2724_s6 = inlined_call_operand.vmem [shape: f32[1,32], index: 6, kind: input, shape index: {}]   ;;  %s2725_s7 = inlined_call_operand.hbm [shape: f32[2,16,16], index: 7, kind: input, shape index: {}]   ;;  %s2726_s8 = inlined_call_operand.hbm [shape: f32[2,8,8,32], index: 8, kind: output, shape index: {}]  }
   0x1   :  { %2737 = sst [smem:[#allocation19_spill]] %s2721_s3 }
   0x2   :  { %2738 = sst [smem:[#allocation20_spill]] %s2722_s4 }
   0x3   :  { %2739 = sst [smem:[#allocation21_spill]] %s2723_s5 }
   0x4   :  { %2740 = sst [smem:[#allocation22_spill]] %s2724_s6 }
   0x5   :  { %2741 = sst [smem:[#allocation23_spill]] %s2725_s7 }
   0x6   :  { %2742 = sst [smem:[#allocation24_spill]] %s2726_s8 }
   0x7   :  { %13 = vsyncpa [#allocation3], 0 }
   0x8   :  { %15 = vsyncpa [#allocation3 + $0x1], 0 }
   0x9   :  { %16 = vsyncpa [#allocation6], 0 }
   0xa   :  { %17 = vsyncpa [#allocation9], 0 }
   0xb   :  { %18 = vsyncpa [#allocation4], 0 }
   0xc   :  { %20 = vsyncpa [#allocation4 + $0x1], 0  ;;  %s2178_s27 = smov 0   ;;  %s2180_s28 = smov 0  }
   0xd   :  { %s2182_s29 = smov 0   ;;  %s2184_s30 = smov 0  }
   0xe   :  { %s2186_s9 = smov 0   ;;  %s2188_s10 = smov 0  }
   0xf   :  { %s2190_s11 = smov 0   ;;  %s2192_s12 = smov 0  }
  0x10 LB: > { %2743 = sst [smem:[#allocation15_spill]] %s2083_s27  ;;  %s1570_s13 = sadd.s32 4294967295, %s2111_s12   ;;  %s2111_s12 = sphi %s2192_s12, %s26_s12   ;;  %s2107_s11 = sphi %s2190_s11, %s2780_s11   ;;  %s2103_s10 = sphi %s2188_s10, %s2779_s10   ;;  %s2099_s9 = sphi %s2186_s9, %s2778_s9   ;;  %s2095_s30 = sphi %s2184_s30, %s2777_s30   ;;  %s2091_s29 = sphi %s2182_s29, %s2776_s29   ;;  %s2087_s28 = sphi %s2180_s28, %s2775_s28   ;;  %s2083_s27 = sphi %s2178_s27, %s2774_s27  }
  0x11   : > { %2744 = sst [smem:[#allocation16_spill]] %s2095_s30  ;;  %s1571_s14 = sadd.s32 4294967294, %s2111_s12  }
  0x12   : > { %2745 = sst [smem:[#allocation17_spill]] %s2099_s9  ;;  %p60_p0 = scmp.ne.s32.totalorder %s2087_s28, %s2083_s27 }
  0x13   : > { %p2222_p1 = scmp.eq.s32.totalorder %s1570_s13, 0  ;;  %p2226_p2 = scmp.eq.s32.totalorder %s1570_s13, 3 }
  0x14   : > { %p239_p3 = scmp.eq.s32.totalorder %s1571_s14, 3  ;;  %p1572_p5 = scmp.ge.s32.totalorder %s2111_s12, 1 }
  0x15   : > { %s2746_s15 = scalar_select %p2222_p1, 1, 0 }
  0x16   : > { %s2747_s16 = scalar_select %p2226_p2, 1, 0 }
  0x17   : > { %p2232_p4 = por %p2222_p1, %p60_p0  ;;  %p2237_p6 = por %p239_p3, %p60_p0 }
  0x18   : > { %p246_p7 = scmp.lt.s32.totalorder %s2111_s12, 5  ;;  %s2113_s20 = smov [#allocation5]  }
  0x19   : > { %s2748_s17 = scalar_select %p2232_p4, 1, 0 }
  0x1a   : > { %s2749_s18 = scalar_select %p2237_p6, 1, 0 }
  0x1b   : > { %p2242_p8 = pnand %p1572_p5, %p246_p7  ;;  %s264_s21 = sshll.u32 %s2113_s20, 4  ;;  %s2246_s21 = int_to_ptr.vmem [resolvable:$true] %s264_s21 }
  0x1c   : > { %2750 = sst [smem:[#allocation18_spill]] %s2749_s18  ;;  %s2114_s23 = smov [#allocation7]  }
  0x1d   : > { %s2751_s19 = scalar_select %p2242_p8, 1, 0 }
  0x1e   : > { %p1731_p9 = pneg %p2242_p8  ;;  %s278_s24 = sshll.u32 %s2114_s23, 4  ;;  %s2256_s24 = int_to_ptr.vmem [resolvable:$true] %s278_s24 }
  0x1f   : > { %s2115_s25 = smov [#allocation8]   ;;  %s2753_s3 = sld [smem:[#allocation19_spill]] }
  0x20   : > { %p2252_p10 = pnand %p1731_p9, %p2222_p1  ;;  %s2258_s26 = sshll.u32 %s2115_s25, 4  ;;  %s295_s26 = int_to_ptr.vmem [resolvable:$true] %s2258_s26 }
  0x22   : > { %p2268_p12 = pneg %p2252_p10 }
  0x25   : > { %s1891_s20 = scalar_lea.hbm %s2753_s3, 256 }
  0x26   : > { %p1892_p11 = scmp.ne.s32.totalorder %s2753_s3, %s1891_s20  ;;  %p1898_p3 = scmp.lt.u32.totalorder %s1891_s20, %s2753_s3 }
  0x28   : > { %p1894_p13 = pnand %p2268_p12, %p1892_p11 }
  0x2a   : > { %p1895_p0 = pneg %p1894_p13 }
  0x2c   : > { %p1900_p5 = pnand %p1898_p3, %p1895_p0 }
  0x2e   : > { %1903 = shalt.err (!%p1900_p5)
}
  0x2f   : > { %s1904_s27 = scalar_lea.vmem %s2246_s21, 256  ;;  %p1912_p1 = scmp.lt.s32.totalorder %s2246_s21, %s2246_s21 }
  0x30   : > { %p1905_p7 = scmp.ne.s32.totalorder %s2246_s21, %s1904_s27  ;;  %p1913_p4 = scmp.lt.s32.totalorder %s1904_s27, %s1904_s27 }
  0x32   : > { %p1907_p9 = pnand %p1905_p7, %p2268_p12  ;;  %p1914_p11 = por %p1913_p4, %p1912_p1 }
  0x34   : > { %p1908_p6 = pneg %p1907_p9 }
  0x36   : > { %p1915_p13 = pnand %p1914_p11, %p1908_p6 }
  0x38   : > { %1918 = shalt.err (!%p1915_p13)
}
  0x39   : > { %s2116_s18 = smov 64   ;;  %s2117_s13 = smov 4  }
  0x3a   : > { %1734 = dma.hbm_to_vmem [thread:$0]  (!%p2252_p10), %s2753_s3, 256, %s2246_s21, [#allocation6], %s2116_s18, %s2116_s18, %s2117_s13  }
  0x3b   : > { %s2755_s4 = sld [smem:[#allocation20_spill]] }
  0x41   : > { %s1919_s6 = scalar_lea.hbm %s2755_s4, 16 }
  0x42   : > { %p1920_p1 = scmp.ne.s32.totalorder %s2755_s4, %s1919_s6  ;;  %p1926_p0 = scmp.lt.u32.totalorder %s1919_s6, %s2755_s4 }
  0x44   : > { %p1922_p4 = pnand %p1920_p1, %p2268_p12 }
  0x46   : > { %p1923_p6 = pneg %p1922_p4 }
  0x48   : > { %p1928_p3 = pnand %p1926_p0, %p1923_p6 }
  0x4a   : > { %1931 = shalt.err (!%p1928_p3)
}
  0x4b   : > { %s1932_s21 = scalar_lea.vmem %s2256_s24, 16  ;;  %s1939_s30 = scalar_lea.vmem %s2256_s24, 32 }
  0x4c   : > { %p1933_p5 = scmp.ne.s32.totalorder %s2256_s24, %s1932_s21  ;;  %p1940_p11 = scmp.lt.s32.totalorder %s2256_s24, %s2256_s24 }
  0x4d   : > { %p1941_p13 = scmp.lt.s32.totalorder %s1939_s30, %s1932_s21 }
  0x4e   : > { %p1935_p7 = pnand %p1933_p5, %p2268_p12 }
  0x4f   : > { %p1942_p1 = por %p1941_p13, %p1940_p11 }
  0x50   : > { %p1936_p9 = pneg %p1935_p7 }
  0x52   : > { %p1943_p4 = pnand %p1942_p1, %p1936_p9 }
  0x54   : > { %1946 = shalt.err (!%p1943_p4)
}
  0x55   : > { %1737 = dma.hbm_to_vmem [thread:$0]  (!%p2252_p10), %s2755_s4, 16, %s2256_s24, [#allocation6]  }
  0x56   : > { %s2756_s7 = sld [smem:[#allocation23_spill]] }
  0x5c   : > { %s1947_s13 = scalar_lea.hbm %s2756_s7, 512 }
  0x5d   : > { %p1948_p6 = scmp.ne.s32.totalorder %s2756_s7, %s1947_s13  ;;  %p1954_p5 = scmp.lt.u32.totalorder %s1947_s13, %s2756_s7 }
  0x5f   : > { %p1950_p0 = pnand %p1948_p6, %p2268_p12 }
  0x61   : > { %p1951_p3 = pneg %p1950_p0 }
  0x63   : > { %p1956_p7 = pnand %p1954_p5, %p1951_p3 }
  0x65   : > { %1959 = shalt.err (!%p1956_p7)
}
  0x66   : > { %s1960_s27 = scalar_lea.vmem %s295_s26, 512  ;;  %p1968_p1 = scmp.lt.s32.totalorder %s295_s26, %s295_s26 }
  0x67   : > { %p1961_p9 = scmp.ne.s32.totalorder %s295_s26, %s1960_s27  ;;  %p1969_p4 = scmp.lt.s32.totalorder %s1960_s27, %s1960_s27 }
  0x69   : > { %p1963_p11 = pnand %p1961_p9, %p2268_p12  ;;  %p1970_p8 = por %p1969_p4, %p1968_p1 }
  0x6b   : > { %p1964_p13 = pneg %p1963_p11 }
  0x6d   : > { %p1971_p2 = pnand %p1970_p8, %p1964_p13 }
  0x6f   : > { %1974 = shalt.err (!%p1971_p2)
}
  0x70   : > { %s2735_s24 = smov 128   ;;  %s2736_s8 = smov 8  }
  0x71   : > { %1740 = dma.hbm_to_vmem [thread:$0]  (!%p2252_p10), %s2756_s7, 512, %s295_s26, [#allocation9], %s2735_s24, %s2735_s24, %s2736_s8  }
  0x72   : > { %s35_s5 = sadd.s32 1, %s2103_s10  ;;  %s38_s6 = sadd.s32 1, %s2107_s11 }
  0x73   : > { %p36_p2 = scmp.ge.s32.totalorder %s35_s5, 2  ;;  %s47_s9 = sadd.s32 1, %s2091_s29 }
  0x74   : > { %p54_p8 = scmp.ne.s32.totalorder %s2091_s29, %s2087_s28  ;;  %p55_p12 = scmp.eq.s32.totalorder %s2111_s12, 0 }
  0x75   : > { %s2782_s5 = smov (%p36_p2, %s35_s5), 0  ;;  %s2784_s6 = smov (!%p36_p2, %s38_s6), %s2107_s11 }
  0x76   : > { %s43_s22 = ssub.s32 %s2103_s10, %s2782_s5  ;;  %p40_p6 = scmp.ge.s32.totalorder %s2784_s6, 2 }
  0x77   : > { %p2757_p0 = scmp.ne.s32.totalorder %s2747_s16, 0  ;;  %p2352_p10 = por %p55_p12, %p54_p8 }
  0x78   : > { %p1752_p5 = scmp.lt.s32.totalorder %s2111_s12, 4  ;;  %s2786_s6 = smov (%p40_p6, %s2784_s6), 0 }
  0x79   : > { %p2348_p3 = por %p2757_p0, %p54_p8  ;;  %s308_s13 = sand.u32 1, %s2091_s29  }
  0x7a   : > { %s1578_s14 = sshll.u32 %s2103_s10, 2  ;;  %s42_s20 = ssub.s32 %s2107_s11, %s2786_s6 }
  0x7b   : > { %s44_s23 = sor.u32 %s43_s22, %s42_s20  ;;  %s1577_s25 = sshll.u32 %s308_s13, 5 }
  0x7c   : > { %p45_p7 = scmp.eq.s32.totalorder %s44_s23, 0  ;;  %s1579_s16 = sshll.u32 %s2107_s11, 3 }
  0x7d   : > { %s312_s27 = scalar_lea.vmem [#allocation2], %s1577_s25  ;;  %s318_s24 = sadd.s32 %s1579_s16, %s1578_s14 }
  0x7e   : > { %s321_s21 = sshll.u32 %s312_s27, 4  ;;  %s1580_s8 = sshll.u32 %s318_s24, 7  ;;  %s2367_s21 = int_to_ptr.vmem [resolvable:$true] %s321_s21 }
  0x7f   : > { %s2365_s30 = scalar_select %p45_p7, %s2091_s29, %s47_s9  }
  0x80   : > { %p2373_p9 = pnand %p1752_p5, %p2352_p10  ;;  %s2380_s22 = scalar_lea.hbm %s2718_s0, %s1580_s8 }
  0x81   : > { %s2382_s9 = scalar_lea.sflag [#allocation3], %s308_s13  ;;  %s1975_s24 = scalar_lea.hbm %s2380_s22, 512 }
  0x82   : > { %p1976_p11 = scmp.ne.s32.totalorder %s2380_s22, %s1975_s24  ;;  %p1977_p13 = pneg %p2373_p9 }
  0x83   : > { %s1980_s7 = scalar_lea.hbm %s2718_s0, 2048  ;;  %p1981_p2 = scmp.lt.u32.totalorder %s2380_s22, %s2718_s0 }
  0x84   : > { %p1978_p1 = pnand %p1977_p13, %p1976_p11  ;;  %p1982_p8 = scmp.lt.u32.totalorder %s1980_s7, %s1975_s24 }
  0x85   : > { %p1984_p6 = scmp.lt.u32.totalorder %s1975_s24, %s2380_s22 }
  0x86   : > { %p1979_p4 = pneg %p1978_p1  ;;  %p1983_p12 = por %p1982_p8, %p1981_p2 }
  0x88   : > { %p1985_p0 = por %p1984_p6, %p1983_p12 }
  0x8a   : > { %p1986_p10 = pnand %p1985_p0, %p1979_p4 }
  0x8c   : > { %1989 = shalt.err (!%p1986_p10)
}
  0x8d   : > { %s1990_s13 = scalar_lea.vmem %s2367_s21, 512  ;;  %s2120_s20 = smov [#allocation2]  }
  0x8e   : > { %p1991_p5 = scmp.ne.s32.totalorder %s2367_s21, %s1990_s13  ;;  %s1995_s23 = sshll.u32 %s2120_s20, 4  ;;  %s1996_s23 = int_to_ptr.vmem [resolvable:$false] %s1995_s23 }
  0x8f   : > { %s1997_s25 = scalar_lea.vmem %s1996_s23, 1024  ;;  %p1998_p1 = scmp.lt.s32.totalorder %s2367_s21, %s1996_s23 }
  0x90   : > { %p1993_p7 = pnand %p1991_p5, %p1977_p13  ;;  %p1999_p2 = scmp.lt.s32.totalorder %s1997_s25, %s1990_s13 }
  0x92   : > { %p1994_p11 = pneg %p1993_p7  ;;  %p2000_p8 = por %p1999_p2, %p1998_p1 }
  0x94   : > { %p2001_p12 = pnand %p2000_p8, %p1994_p11 }
  0x96   : > { %2004 = shalt.err (!%p2001_p12)
}
  0x97   : > { %s2761_s16 = smov 8   ;;  %s2762_s27 = smov 128  }
  0x98   : > { %1744 = dma.hbm_to_vmem [thread:$0]  (!%p2373_p9), %s2380_s22, 512, %s2367_s21, %s2382_s9, %s2762_s27, %s2762_s27, %s2761_s16  }
  0x99   : > { %p2763_p13 = scmp.ne.s32.totalorder %s2751_s19, 0 }
  0x9a   : > { %s2416_s24 = sand.u32 (!%p2763_p13), 1, %s2087_s28   ;;  %p2764_p4 = scmp.ne.s32.totalorder (!%p2763_p13), %s2748_s17, 0 }
  0x9b   : > { %333 = sbr.rel (%p2763_p13) target bundleno = 2402 (0x962), region = 52  ;;  %s1582_s26 = sshll.u32 (!%p2763_p13), %s2416_s24, 5 }
  0x9c   : > { %s336_s4 = scalar_lea.sflag (!%p2763_p13), [#allocation3], %s2416_s24  ;;  %s339_s3 = scalar_lea.vmem (!%p2763_p13), [#allocation2], %s1582_s26 }
  0xa2   : > { %2066 = dma.done.wait (%p2764_p4), %s336_s4, 512  }
  0xa3   : > { %2068 = vsyncadd (%p2764_p4), %s336_s4, 4294966784  ;;  %p2765_p9 = scmp.ne.s32.totalorder %s2746_s15, 0 }
  0xa5   : > { %2070 = dma.done.wait (%p2765_p9), [#allocation6], 272  }
  0xa6   : > { %2072 = vsyncadd (%p2765_p9), [#allocation6], 4294967024 }
  0xa7   : > { %2074 = dma.done.wait (%p2765_p9), [#allocation9], 512  }
  0xa8   : > { %2076 = vsyncadd (%p2765_p9), [#allocation9], 4294966784  ;;  %v2434_v0 = vld [vmem:[%s339_s3] sm:$0xff]  ;;  %v2436_v1 = vld [vmem:[%s339_s3 + $0x8] sm:$0xff]  ;;  %vm413_vm0 = vcmask 261120   ;;  %v438_v14 = vlaneseq  ;;  %vm2124_vm1 = vmmov 0  }
  0xa9   : > { %v2438_v2 = vld [vmem:[%s339_s3 + $0x10] sm:$0xff]  ;;  %v405_v3 = vcombine.low %v2434_v0, %v2436_v1  ;;  %v1587_v4 = vcombine.high %v2434_v0, %v2436_v1  ;;  %v2444_v5 = vld [vmem:[%s339_s3 + $0x18] sm:$0xff]  ;;  %v2121_v12 = vmov 839922192   ;;  %v2122_v15 = vmov 1985246804  }
  0xaa   : > { %v406_v6 = vcombine.low %v2438_v2, %v2444_v5  ;;  %v1588_v7 = vcombine.high %v2438_v2, %v2444_v5  ;;  %v436_v13 = vunpack.c.l.s4 %v2121_v12  ;;  %v443_v16 = vunpack.c.l.s4 %v2122_v15  ;;  %s2125_s22 = smov 96   ;;  %s2126_s9 = smov 64  }
  0xab   : > { %v414_v8 = vsel %vm413_vm0, %v405_v3, 0.0  ;;  %v420_v9 = vsel %vm413_vm0, %v1587_v4, 0.0  ;;  %v439_v18 = vshrl.u32 %v438_v14, 7  ;;  %v2460_v25 = vcombine.high %v2436_v1, %v2436_v1  ;;  %s2127_s7 = smov 80   ;;  %s2128_s8 = smov 112  }
  0xac   : > { %415 = vadd.xlane.f32.xlu0 %v414_v8  ;;  %421 = vadd.xlane.f32.xlu1 %v420_v9  ;;  %v417_v10 = vsel %vm413_vm0, %v406_v6, 0.0  ;;  %v423_v11 = vsel %vm413_vm0, %v1588_v7, 0.0  ;;  %v437_v17 = vunpack.c.0.s8 %v436_v13  ;;  %v444_v19 = vunpack.c.0.s8 %v443_v16  ;;  %v1847_v6 = vld [vmem:[#allocation5] sm:$0xff]   ;;  %v1848_v7 = vld [vmem:[#allocation5 + $0x8] sm:$0xff]   ;;  %s2129_s14 = smov 48   ;;  %s2766_s23 = sld [smem:[#allocation21_spill]] }
  0xad   : > { %v2464_v26 = vcombine.high %v2434_v0, %v2434_v0  ;;  %v2484_v39 = vcombine.high %v2438_v2, %v2438_v2  ;;  %v2488_v40 = vcombine.high %v2444_v5, %v2444_v5  ;;  %1643 = vmatprep.subr.bf16.mxu0 %v1847_v6  ;;  %vm768_vm2 = vcmask 130048   ;;  %s2767_s27 = sld [smem:[#allocation16_spill]]  ;;  %s2768_s4 = sld [smem:[#allocation17_spill]] }
  0xae   : > { %v2454_v20 = vsub.s32 %v437_v17, %v439_v18  ;;  %v2456_v21 = vsub.s32 %v444_v19, %v439_v18  ;;  %1644 = vmatpush3.bf16.msra.mxu0 %v1847_v6  ;;  %s2769_s17 = sld [smem:[#allocation22_spill]]  ;;  %s2770_s20 = sld [smem:[#allocation24_spill]] }
  0xaf   : > { %1645 = vmatprep.subr.bf16.mxu0 %v1848_v7 }
  0xb0   : > { %418 = vadd.xlane.f32.xlu0 %v417_v10  ;;  %424 = vadd.xlane.f32.xlu1 %v423_v11 }
  0xb2   : > { %1646 = vmatpush3.bf16.msra.mxu0 %v1848_v7 }
  0xb3   : > { %s1612_s19 = sshll.u32 %s2767_s27, 2  ;;  %s1613_s21 = sshll.u32 %s2768_s4, 3 }
  0xb4   : > { %s2130_s27 = smov [#allocation10]  }
  0xb5   : > { %s2009_s4 = sshll.u32 %s2130_s27, 4  ;;  %s2010_s4 = int_to_ptr.vmem [resolvable:$false] %s2009_s4 }
  0xb6   : > { %s2011_s3 = scalar_lea.vmem %s2010_s4, 1024 }
 0x139   : > { %v416_v22 = vpop.xlane.xlu0 %415  ;;  %v422_v23 = vpop.xlane.xlu1 %421 }
 0x13a   : > { %v427_v24 = vmul.f32 0.03125, %v416_v22  ;;  %v429_v27 = vmul.f32 0.03125, %v422_v23  ;;  %v1589_v22 = vld [vmem:[%s2719_s1] ss:$0 sm:$0xff] }
 0x13c   : > { %v441_v28 = vrot.slane %v427_v24, %v2454_v20  ;;  %v448_v29 = vrot.slane %v427_v24, %v2456_v21  ;;  %v469_v30 = vrot.slane %v429_v27, %v2454_v20  ;;  %v476_v31 = vrot.slane %v429_v27, %v2456_v21  ;;  %v1590_v24 = vld [vmem:[%s2720_s2] ss:$0 sm:$0xff] }
 0x13d   : > { %v419_v32 = vpop.xlane.xlu0 %418  ;;  %v425_v33 = vpop.xlane.xlu1 %424 }
 0x13e   : > { %v2471_v34 = vsub.f32 %v2434_v0, %v441_v28  ;;  %v2474_v35 = vsub.f32 %v2436_v1, %v448_v29  ;;  %v2477_v36 = vsub.f32 %v2464_v26, %v469_v30  ;;  %v2480_v37 = vsub.f32 %v2460_v25, %v476_v31 }
 0x13f   : > { %v428_v38 = vmul.f32 0.03125, %v419_v32  ;;  %v430_v41 = vmul.f32 0.03125, %v425_v33  ;;  %v637_v29 = vcombine.high %v1589_v22, %v1589_v22  ;;  %v653_v33 = vcombine.high %v1590_v24, %v1590_v24 }
 0x140   : > { %v507_v42 = vmul.f32 %v2471_v34, %v2471_v34  ;;  %v508_v43 = vmul.f32 %v2474_v35, %v2474_v35  ;;  %v511_v44 = vmul.f32 %v2477_v36, %v2477_v36  ;;  %v512_v45 = vmul.f32 %v2480_v37, %v2480_v37 }
 0x141   : > { %v455_v46 = vrot.slane %v428_v38, %v2454_v20  ;;  %v462_v47 = vrot.slane %v428_v38, %v2456_v21  ;;  %v483_v48 = vrot.slane %v430_v41, %v2454_v20  ;;  %v490_v49 = vrot.slane %v430_v41, %v2456_v21 }
 0x142   : > { %v523_v50 = vcombine.low %v507_v42, %v508_v43  ;;  %v525_v51 = vcombine.low %v511_v44, %v512_v45 }
 0x143   : > { %v501_v52 = vsub.f32 %v2438_v2, %v455_v46  ;;  %v502_v53 = vsub.f32 %v2444_v5, %v462_v47  ;;  %v2505_v54 = vsub.f32 %v2484_v39, %v483_v48  ;;  %v2508_v55 = vsub.f32 %v2488_v40, %v490_v49 }
 0x144   : > { %v531_v56 = vsel %vm413_vm0, %v523_v50, 0.0  ;;  %v537_v61 = vsel %vm413_vm0, %v525_v51, 0.0 }
 0x145   : > { %532 = vadd.xlane.f32.xlu0 %v531_v56  ;;  %v509_v57 = vmul.f32 %v501_v52, %v501_v52  ;;  %v510_v58 = vmul.f32 %v502_v53, %v502_v53  ;;  %v513_v59 = vmul.f32 %v2505_v54, %v2505_v54  ;;  %v514_v60 = vmul.f32 %v2508_v55, %v2508_v55 }
 0x147   : > { %v524_v62 = vcombine.low %v509_v57, %v510_v58  ;;  %v526_v63 = vcombine.low %v513_v59, %v514_v60 }
 0x149   : > { %v534_v3 = vsel %vm413_vm0, %v524_v62, 0.0  ;;  %538 = vadd.xlane.f32.xlu0 %v537_v61  ;;  %v540_v4 = vsel %vm413_vm0, %v526_v63, 0.0 }
 0x14a   : > { %535 = vadd.xlane.f32.xlu1 %v534_v3 }
 0x14e   : > { %541 = vadd.xlane.f32.xlu1 %v540_v4 }
 0x1d2   : > { %v533_v8 = vpop.xlane.xlu0 %532 }
 0x1d3   : > { %v543_v9 = vmul.f32 0.03125, %v533_v8 }
 0x1d5   : > { %v547_v10 = vadd.f32 1e-05, %v543_v9 }
 0x1d6   : > { %v539_v11 = vpop.xlane.xlu0 %538 }
 0x1d7   : > { %1851 = vrsqrt.f32 %v547_v10  ;;  %v536_v12 = vpop.xlane.xlu1 %535  ;;  %v545_v13 = vmul.f32 0.03125, %v539_v11 }
 0x1d8   : > { %v544_v14 = vmul.f32 0.03125, %v536_v12  ;;  %v1591_v12 = vld [vmem:[#allocation7] ss:$0 sm:$0xff] }
 0x1d9   : > { %v549_v15 = vadd.f32 1e-05, %v545_v13 }
 0x1da   : > { %v548_v16 = vadd.f32 1e-05, %v544_v14 }
 0x1db   : > { %1853 = vrsqrt.f32 %v549_v15  ;;  %v542_v17 = vpop.xlane.xlu1 %541 }
 0x1dc   : > { %1855 = vrsqrt.f32 %v548_v16  ;;  %v546_v18 = vmul.f32 0.03125, %v542_v17 }
 0x1de   : > { %v550_v19 = vadd.f32 1e-05, %v546_v18 }
 0x1e0   : > { %1857 = vrsqrt.f32 %v550_v19 }
 0x1e1   : > { %v1852_v23 = vpop.eup %1851 }
 0x1e2   : > { %v565_v27 = vrot.slane %v1852_v23, %v2454_v20  ;;  %v572_v28 = vrot.slane %v1852_v23, %v2456_v21 }
 0x1e4   : > { %v623_v30 = vmul.f32 %v565_v27, %v2471_v34  ;;  %v624_v31 = vmul.f32 %v572_v28, %v2474_v35 }
 0x1e5   : > { %v1854_v32 = vpop.eup %1853 }
 0x1e6   : > { %v1856_v38 = vpop.eup %1855  ;;  %v593_v41 = vrot.slane %v1854_v32, %v2454_v20  ;;  %v600_v42 = vrot.slane %v1854_v32, %v2456_v21  ;;  %v639_v43 = vmul.f32 %v1589_v22, %v623_v30  ;;  %v640_v44 = vmul.f32 %v637_v29, %v624_v31  ;;  %v759_v30 = vld [vmem:[#allocation8] sm:$0xff] }
 0x1e7   : > { %v579_v45 = vrot.slane %v1856_v38, %v2454_v20  ;;  %v586_v46 = vrot.slane %v1856_v38, %v2456_v21  ;;  %v760_v38 = vld [vmem:[#allocation8 + $0x8] sm:$0xff] }
 0x1e8   : > { %v627_v47 = vmul.f32 %v593_v41, %v2477_v36  ;;  %v628_v48 = vmul.f32 %v600_v42, %v2480_v37  ;;  %v655_v50 = vadd.f32 %v1590_v24, %v639_v43  ;;  %v656_v51 = vadd.f32 %v653_v33, %v640_v44 }
 0x1e9   : > { %v625_v34 = vmul.f32 %v579_v45, %v501_v52  ;;  %v626_v49 = vmul.f32 %v586_v46, %v502_v53 }
 0x1ea   : > { %v1858_v35 = vpop.eup %1857  ;;  %v643_v56 = vmul.f32 %v1589_v22, %v627_v47  ;;  %v644_v57 = vmul.f32 %v637_v29, %v628_v48  ;;  %v671_v37 = vcombine.low %v655_v50, %v656_v51 }
 0x1eb   : > { %v607_v58 = vrot.slane %v1858_v35, %v2454_v20  ;;  %v614_v59 = vrot.slane %v1858_v35, %v2456_v21  ;;  %v641_v60 = vmul.f32 %v1589_v22, %v625_v34  ;;  %v642_v61 = vmul.f32 %v637_v29, %v626_v49 }
 0x1ec   : > { %v659_v52 = vadd.f32 %v1590_v24, %v643_v56  ;;  %v660_v7 = vadd.f32 %v653_v33, %v644_v57 }
 0x1ed   : > { %v629_v62 = vmul.f32 %v607_v58, %v2505_v54  ;;  %v630_v63 = vmul.f32 %v614_v59, %v2508_v55  ;;  %v657_v36 = vadd.f32 %v1590_v24, %v641_v60  ;;  %v658_v3 = vadd.f32 %v653_v33, %v642_v61 }
 0x1ee   : > { %v673_v20 = vcombine.low %v659_v52, %v660_v7  ;;  %v2123_v54 = vmov 0.0  }
 0x1ef   : > { %v672_v53 = vcombine.low %v657_v36, %v658_v3  ;;  %v645_v4 = vmul.f32 %v1589_v22, %v629_v62  ;;  %v646_v6 = vmul.f32 %v637_v29, %v630_v63  ;;  %1657 = vmatprep.subr.bf16.mxu0 %v2123_v54  ;;  %1651 = vmatprep.subr.bf16.mxu1 %v2123_v54 }
 0x1f0   : > { %1653 = vmatprep.mubr.msk.bf16.mxu1 %vm2124_vm1, %v2123_v54 }
 0x1f1   : > { %v679_v8 = vpack.c.bf16 %v672_v53, %v671_v37  ;;  %v661_v9 = vadd.f32 %v1590_v24, %v645_v4  ;;  %v662_v10 = vadd.f32 %v653_v33, %v646_v6 }
 0x1f3   : > { %1647 = vmatprep.mubr.msk.bf16.mxu0 %vm413_vm0, %v679_v8  ;;  %v674_v21 = vcombine.low %v661_v9, %v662_v10 }
 0x1f5   : > { %v680_v11 = vpack.c.bf16 %v674_v21, %v673_v20 }
 0x1f7   : > { %1648 = vmatmul.mubr.msk.bf16.vlgmr.msra.gmra.mrb[0].mxu0 %vm413_vm0, %v680_v11 }
 0x1f8   : > { %1659 = vmatprep.mubr.msk.bf16.mxu0 %vm2124_vm1, %v2123_v54 }
 0x2ca   : > { %v1649_v55 = vpop.f32.mrb[0].mxu0 }
 0x2cb   : > { %v744_v13 = vpop.f32.mrb[1].mxu0  ;;  %v753_v15 = vadd.f32 %v1649_v55, %v1591_v12 }
 0x2cc   : > { %v1650_v14 = vpop.f32.mrb[2].mxu0  ;;  %v745_v18 = vadd.f32 %v1591_v12, %v744_v13 }
 0x2cd   : > { %v756_v16 = vadd.f32 %v1650_v14, %v1591_v12  ;;  %v747_v17 = vpop.f32.mrb[3].mxu0 }
 0x2ce   : > { %v748_v19 = vadd.f32 %v1591_v12, %v747_v17 }
 0x2cf   : > { %v2546_v22 = vpack.c.bf16 %v756_v16, %v753_v15 }
 0x2d0   : > { %v2548_v23 = vpack.c.bf16 %v748_v19, %v745_v18 }
 0x2d1   : > { %817 = vrot.lane.b32.xlu1 %v2546_v22, %s2125_s22 }
 0x2d2   : > { %766 = vrot.lane.b32.xlu0 %v2548_v23, %s2125_s22  ;;  %s1448_s22 = sadd.s32 %s1613_s21, %s1612_s19 }
 0x343   : > { %v818_v24 = vpop.permute.xlu1 %817 }
 0x344   : > { %v823_v27 = vsel %vm768_vm2, %v818_v24, 0  ;;  %v767_v28 = vpop.permute.xlu0 %766 }
 0x345   : > { %1658 = vmatpush3.bf16.xpose.msra.mxu0 %v823_v27  ;;  %v773_v29 = vsel %vm768_vm2, %v767_v28, 0 }
 0x346   : > { %1652 = vmatpush3.bf16.xpose.msra.mxu1 %v773_v29  ;;  %1669 = vmatprep.subr.bf16.mxu0 %v2123_v54 }
 0x347   : > { %1663 = vmatprep.subr.bf16.mxu1 %v2123_v54 }
 0x34c   : > { %1660 = vmatmul.mubr.msk.bf16.vlgmr.msra.gmra.mrb[4].mxu0 %vm768_vm2, %v2546_v22 }
 0x34d   : > { %1654 = vmatmul.mubr.msk.bf16.vlgmr.msra.gmra.mrb[0].mxu1 %vm768_vm2, %v2548_v23  ;;  %1671 = vmatprep.mubr.msk.bf16.mxu0 %vm2124_vm1, %v2123_v54 }
 0x34e   : > { %1665 = vmatprep.mubr.msk.bf16.mxu1 %vm2124_vm1, %v2123_v54 }
 0x41f   : > { %v859_v31 = vpop.f32.mrb[4].mxu0 }
 0x420   : > { %v809_v32 = vpop.f32.mrb[0].mxu1  ;;  %v1661_v33 = vpop.f32.mrb[5].mxu0  ;;  %v860_v49 = vadd.f32 %v859_v31, %v759_v30 }
 0x421   : > { %v810_v41 = vadd.f32 %v809_v32, %v759_v30  ;;  %v1655_v42 = vpop.f32.mrb[1].mxu1  ;;  %v862_v43 = vpop.f32.mrb[6].mxu0 }
 0x422   : > { %v812_v44 = vpop.f32.mrb[2].mxu1  ;;  %v1662_v45 = vpop.f32.mrb[7].mxu0  ;;  %v863_v46 = vadd.f32 %v862_v43, %v760_v38  ;;  %v872_v51 = vsel %vm768_vm2, %v860_v49, -inf }
 0x423   : > { %v813_v47 = vadd.f32 %v812_v44, %v760_v38  ;;  %v1656_v48 = vpop.f32.mrb[3].mxu1  ;;  %v866_v34 = vsel %vm768_vm2, %v810_v41, -inf }
 0x424   : > { %867 = vmax.xlane.f32.xlu1 %v866_v34  ;;  %v875_v50 = vsel %vm768_vm2, %v863_v46, -inf }
 0x425   : > { %v869_v35 = vsel %vm768_vm2, %v813_v47, -inf }
 0x426   : > { %870 = vmax.xlane.f32.xlu0 %v869_v35 }
 0x428   : > { %876 = vmax.xlane.f32.xlu1 %v875_v50 }
 0x42a   : > { %873 = vmax.xlane.f32.xlu0 %v872_v51 }
 0x439   : > { %959 = vrot.lane.b32.xlu1 %v2546_v22, %s2126_s9 }
 0x43d   : > { %1012 = vrot.lane.b32.xlu1 %v2548_v23, %s2127_s7 }
 0x4b1   : > { %v868_v56 = vpop.xlane.xlu1 %867 }
 0x4b2   : > { %v878_v60 = vsub.f32 %v810_v41, %v868_v56 }
 0x4b3   : > { %v871_v57 = vpop.xlane.xlu0 %870 }
 0x4b4   : > { %v879_v58 = vsub.f32 %v813_v47, %v871_v57  ;;  %v882_v52 = vmul.f32 1.442695, %v878_v60 }
 0x4b5   : > { %v877_v59 = vpop.xlane.xlu1 %876 }
 0x4b6   : > { %v881_v61 = vsub.f32 %v863_v46, %v877_v59  ;;  %v884_v62 = vmul.f32 1.442695, %v879_v58  ;;  %v761_v58 = vld [vmem:[#allocation8 + $0x10] sm:$0xff] }
 0x4b7   : > { %v874_v63 = vpop.xlane.xlu0 %873 }
 0x4b8   : > { %v888_v36 = vmul.f32 1.442695, %v881_v61  ;;  %v880_v3 = vsub.f32 %v860_v49, %v874_v63 }
 0x4b9   : > { %v960_v37 = vpop.permute.xlu1 %959 }
 0x4ba   : > { %1859 = vpow2.f32 %v888_v36  ;;  %v886_v53 = vmul.f32 1.442695, %v880_v3  ;;  %1670 = vmatpush3.bf16.msra.mxu0 %v960_v37 }
 0x4bb   : > { %1861 = vpow2.f32 %v884_v62  ;;  %1681 = vmatprep.subr.bf16.mxu0 %v2123_v54  ;;  %v762_v62 = vld [vmem:[#allocation8 + $0x18] sm:$0xff] }
 0x4bc   : > { %1863 = vpow2.f32 %v886_v53 }
 0x4bd   : > { %1865 = vpow2.f32 %v882_v52  ;;  %v1013_v11 = vpop.permute.xlu1 %1012 }
 0x4be   : > { %v1018_v38 = vsel %vm768_vm2, %v1013_v11, 0 }
 0x4c4   : > { %v1860_v4 = vpop.eup %1859 }
 0x4c5   : > { %v1862_v6 = vpop.eup %1861  ;;  %v899_v7 = vsel %vm768_vm2, %v1860_v4, 0.0 }
 0x4c6   : > { %v1864_v8 = vpop.eup %1863  ;;  %900 = vadd.xlane.f32.xlu1 %v899_v7  ;;  %v893_v20 = vsel %vm768_vm2, %v1862_v6, 0.0 }
 0x4c7   : > { %v896_v9 = vsel %vm768_vm2, %v1864_v8, 0.0  ;;  %v1866_v10 = vpop.eup %1865 }
 0x4c8   : > { %897 = vadd.xlane.f32.xlu0 %v896_v9  ;;  %v890_v21 = vsel %vm768_vm2, %v1866_v10, 0.0 }
 0x4ca   : > { %894 = vadd.xlane.f32.xlu1 %v893_v20 }
 0x4cc   : > { %891 = vadd.xlane.f32.xlu0 %v890_v21 }
 0x4db   : > { %1063 = vrot.lane.b32.xlu1 %v2546_v22, %s2127_s7  ;;  %s383_s7 = scalar_lea.vmem [#allocation10], %s1582_s26  ;;  %s1436_s26 = scalar_lea.sflag [#allocation4], %s2416_s24 }
 0x4df   : > { %1061 = vrot.lane.b32.xlu1 %v2546_v22, %s2128_s8 }
 0x4e2   : > { %912 = vrot.lane.b32.xlu0 %v2548_v23, %s2126_s9  ;;  %s1614_s9 = sshll.u32 %s1448_s22, 7 }
 0x4e3   : > { %s2659_s25 = scalar_lea.hbm %s2770_s20, %s1614_s9 }
 0x4e6   : > { %1010 = vrot.lane.b32.xlu0 %v2548_v23, %s2128_s8  ;;  %s1451_s8 = sshll.u32 %s383_s7, 4  ;;  %s2661_s8 = int_to_ptr.vmem [resolvable:$true] %s1451_s8 }
 0x4e7   : > { %s2005_s16 = scalar_lea.vmem %s2661_s8, 512  ;;  %p2012_p5 = scmp.lt.s32.totalorder %s2661_s8, %s2010_s4 }
 0x4e8   : > { %p2006_p6 = scmp.ne.s32.totalorder %s2661_s8, %s2005_s16  ;;  %p2013_p7 = scmp.lt.s32.totalorder %s2011_s3, %s2005_s16 }
 0x4ea   : > { %p2007_p0 = pnand %p2006_p6, %p2348_p3  ;;  %p2014_p11 = por %p2013_p7, %p2012_p5 }
 0x4ec   : > { %p2008_p10 = pneg %p2007_p0 }
 0x4ee   : > { %p2015_p1 = pnand %p2014_p11, %p2008_p10 }
 0x553   : > { %v901_v55 = vpop.xlane.xlu1 %900 }
 0x554   : > { %1867 = vrcp.f32 %v901_v55 }
 0x555   : > { %v898_v12 = vpop.xlane.xlu0 %897 }
 0x556   : > { %1869 = vrcp.f32 %v898_v12 }
 0x557   : > { %v895_v13 = vpop.xlane.xlu1 %894 }
 0x558   : > { %1871 = vrcp.f32 %v895_v13 }
 0x559   : > { %v892_v14 = vpop.xlane.xlu0 %891 }
 0x55a   : > { %1873 = vrcp.f32 %v892_v14 }
 0x55b   : > { %v1064_v27 = vpop.permute.xlu1 %1063 }
 0x55c   : > { %v1069_v32 = vsel %vm768_vm2, %v1064_v27, 0 }
 0x55d   : > { %v913_v15 = vpop.permute.xlu0 %912 }
 0x55e   : > { %v1868_v16 = vpop.eup %1867  ;;  %1664 = vmatpush3.bf16.msra.mxu1 %v913_v15 }
 0x55f   : > { %1675 = vmatprep.subr.bf16.mxu1 %v2123_v54  ;;  %v909_v18 = vmul.f32 %v1868_v16, %v1860_v4  ;;  %v1062_v41 = vpop.permute.xlu1 %1061 }
 0x560   : > { %v1870_v17 = vpop.eup %1869 }
 0x561   : > { %v908_v19 = vmul.f32 %v1870_v17, %v1864_v8  ;;  %v1011_v42 = vpop.permute.xlu0 %1010 }
 0x562   : > { %v1872_v24 = vpop.eup %1871 }
 0x563   : > { %v911_v28 = vpack.c.bf16 %v909_v18, %v908_v19  ;;  %v907_v30 = vmul.f32 %v1872_v24, %v1862_v6 }
 0x564   : > { %v1874_v29 = vpop.eup %1873 }
 0x565   : > { %v906_v31 = vmul.f32 %v1874_v29, %v1866_v10  ;;  %1672 = vmatmul.mubr.msk.bf16.vlgmr.msra.gmra.mrb[8].mxu0 %vm768_vm2, %v911_v28 }
 0x566   : > { %1682 = vmatpush3.bf16.xpose.msra.mxu0 %v1069_v32  ;;  %1683 = vmatprep.mubr.msk.bf16.mxu0 %vm2124_vm1, %v2123_v54 }
 0x567   : > { %v910_v33 = vpack.c.bf16 %v907_v30, %v906_v31  ;;  %1693 = vmatprep.subr.bf16.mxu0 %v2123_v54 }
 0x569   : > { %1666 = vmatmul.mubr.msk.bf16.vlgmr.msra.gmra.mrb[4].mxu1 %vm768_vm2, %v910_v33 }
 0x56a   : > { %1676 = vmatpush3.bf16.xpose.msra.mxu1 %v1018_v38  ;;  %1677 = vmatprep.mubr.msk.bf16.mxu1 %vm2124_vm1, %v2123_v54 }
 0x56b   : > { %1687 = vmatprep.subr.bf16.mxu1 %v2123_v54 }
 0x56d   : > { %1684 = vmatmul.mubr.msk.bf16.vlgmr.msra.gmra.mrb[12].mxu0 %vm768_vm2, %v1062_v41 }
 0x56e   : > { %1695 = vmatprep.mubr.msk.bf16.mxu0 %vm2124_vm1, %v2123_v54 }
 0x571   : > { %1678 = vmatmul.mubr.msk.bf16.vlgmr.msra.gmra.mrb[8].mxu1 %vm768_vm2, %v1011_v42 }
 0x572   : > { %1689 = vmatprep.mubr.msk.bf16.mxu1 %vm2124_vm1, %v2123_v54 }
 0x638   : > { %v2600_v43 = vpop.f32.mrb[8].mxu0 }
 0x639   : > { %v1673_v44 = vpop.f32.mrb[9].mxu0 }
 0x63a   : > { %v2602_v45 = vpop.f32.mrb[10].mxu0 }
 0x63b   : > { %v1007_v46 = vpack.c.bf16 %v2602_v45, %v2600_v43  ;;  %v1674_v47 = vpop.f32.mrb[11].mxu0 }
 0x63c   : > { %v2606_v48 = vpop.f32.mrb[4].mxu1 }
 0x63d   : > { %v1667_v34 = vpop.f32.mrb[5].mxu1 }
 0x63e   : > { %v2608_v49 = vpop.f32.mrb[6].mxu1 }
 0x63f   : > { %v1006_v35 = vpack.c.bf16 %v2608_v49, %v2606_v48  ;;  %v1668_v50 = vpop.f32.mrb[7].mxu1 }
 0x640   : > { %v1105_v51 = vpop.f32.mrb[12].mxu0 }
 0x641   : > { %v1685_v54 = vpop.f32.mrb[13].mxu0  ;;  %v1106_v36 = vadd.f32 %v1105_v51, %v761_v58 }
 0x642   : > { %v1108_v56 = vpop.f32.mrb[14].mxu0 }
 0x643   : > { %v1686_v57 = vpop.f32.mrb[15].mxu0  ;;  %v1109_v4 = vadd.f32 %v1108_v56, %v762_v62  ;;  %v1118_v6 = vsel %vm768_vm2, %v1106_v36, -inf }
 0x644   : > { %v1054_v59 = vpop.f32.mrb[8].mxu1 }
 0x645   : > { %v1055_v60 = vadd.f32 %v1054_v59, %v761_v58  ;;  %v1679_v61 = vpop.f32.mrb[9].mxu1  ;;  %v1121_v7 = vsel %vm768_vm2, %v1109_v4, -inf  ;;  %v1849_v58 = vld [vmem:[%s2766_s23 + $0x8] sm:$0xff]   ;;  %v1850_v59 = vld [vmem:[%s2766_s23] sm:$0xff]  }
 0x646   : > { %v1057_v63 = vpop.f32.mrb[10].mxu1 }
 0x647   : > { %v1058_v3 = vadd.f32 %v1057_v63, %v762_v62  ;;  %v1680_v37 = vpop.f32.mrb[11].mxu1  ;;  %v1112_v52 = vsel %vm768_vm2, %v1055_v60, -inf }
 0x648   : > { %1113 = vmax.xlane.f32.xlu0 %v1112_v52 }
 0x649   : > { %v1115_v53 = vsel %vm768_vm2, %v1058_v3, -inf }
 0x64a   : > { %1116 = vmax.xlane.f32.xlu1 %v1115_v53 }
 0x64c   : > { %1119 = vmax.xlane.f32.xlu0 %v1118_v6  ;;  %v1610_v6 = vld [vmem:[%s2769_s17] ss:$0 sm:$0xff] }
 0x650   : > { %1122 = vmax.xlane.f32.xlu0 %v1121_v7 }
 0x6d5   : > { %v1114_v8 = vpop.xlane.xlu0 %1113 }
 0x6d6   : > { %v1124_v9 = vsub.f32 %v1055_v60, %v1114_v8 }
 0x6d7   : > { %v1117_v10 = vpop.xlane.xlu1 %1116 }
 0x6d8   : > { %v1128_v11 = vmul.f32 1.442695, %v1124_v9  ;;  %v1125_v55 = vsub.f32 %v1058_v3, %v1117_v10  ;;  %v1405_v10 = vcombine.high %v1610_v6, %v1610_v6 }
 0x6d9   : > { %v1120_v20 = vpop.xlane.xlu0 %1119 }
 0x6da   : > { %v1126_v21 = vsub.f32 %v1106_v36, %v1120_v20  ;;  %v1130_v15 = vmul.f32 1.442695, %v1125_v55 }
 0x6dc   : > { %v1132_v12 = vmul.f32 1.442695, %v1126_v21 }
 0x6dd   : > { %v1123_v13 = vpop.xlane.xlu0 %1122 }
 0x6de   : > { %1875 = vpow2.f32 %v1132_v12  ;;  %v1127_v14 = vsub.f32 %v1109_v4, %v1123_v13 }
 0x6df   : > { %1877 = vpow2.f32 %v1128_v11 }
 0x6e0   : > { %v1134_v16 = vmul.f32 1.442695, %v1127_v14 }
 0x6e2   : > { %1879 = vpow2.f32 %v1134_v16 }
 0x6e3   : > { %1881 = vpow2.f32 %v1130_v15 }
 0x6e8   : > { %v1876_v17 = vpop.eup %1875 }
 0x6e9   : > { %v1142_v18 = vsel %vm768_vm2, %v1876_v17, 0.0  ;;  %v1878_v19 = vpop.eup %1877 }
 0x6ea   : > { %1143 = vadd.xlane.f32.xlu0 %v1142_v18  ;;  %v1136_v27 = vsel %vm768_vm2, %v1878_v19, 0.0 }
 0x6ec   : > { %v1880_v24 = vpop.eup %1879 }
 0x6ed   : > { %v1145_v28 = vsel %vm768_vm2, %v1880_v24, 0.0  ;;  %v1882_v29 = vpop.eup %1881 }
 0x6ee   : > { %1137 = vadd.xlane.f32.xlu0 %v1136_v27  ;;  %1146 = vadd.xlane.f32.xlu1 %v1145_v28  ;;  %v1139_v30 = vsel %vm768_vm2, %v1882_v29, 0.0 }
 0x6f2   : > { %1140 = vadd.xlane.f32.xlu1 %v1139_v30 }
 0x703   : > { %1205 = vrot.lane.b32.xlu1 %v2546_v22, %s2129_s14 }
 0x704   : > { %1158 = vrot.lane.b32.xlu0 %v2548_v23, %s2129_s14 }
 0x777   : > { %v1144_v31 = vpop.xlane.xlu0 %1143 }
 0x778   : > { %1883 = vrcp.f32 %v1144_v31 }
 0x77b   : > { %v1138_v32 = vpop.xlane.xlu0 %1137  ;;  %v1147_v33 = vpop.xlane.xlu1 %1146 }
 0x77c   : > { %1885 = vrcp.f32 %v1147_v33 }
 0x77d   : > { %1887 = vrcp.f32 %v1138_v32 }
 0x77f   : > { %v1159_v38 = vpop.permute.xlu0 %1158  ;;  %v1141_v41 = vpop.xlane.xlu1 %1140 }
 0x780   : > { %1889 = vrcp.f32 %v1141_v41  ;;  %1688 = vmatpush3.bf16.msra.mxu1 %v1159_v38 }
 0x781   : > { %1699 = vmatprep.subr.bf16.mxu1 %v1849_v58 }
 0x782   : > { %v1884_v44 = vpop.eup %1883 }
 0x783   : > { %v1206_v42 = vpop.permute.xlu1 %1205  ;;  %v1154_v50 = vmul.f32 %v1884_v44, %v1876_v17 }
 0x784   : > { %1694 = vmatpush3.bf16.msra.mxu0 %v1206_v42 }
 0x786   : > { %v1886_v47 = vpop.eup %1885 }
 0x787   : > { %v1888_v34 = vpop.eup %1887  ;;  %v1155_v51 = vmul.f32 %v1886_v47, %v1880_v24 }
 0x788   : > { %v1152_v23 = vmul.f32 %v1888_v34, %v1878_v19 }
 0x789   : > { %v1157_v54 = vpack.c.bf16 %v1155_v51, %v1154_v50 }
 0x78a   : > { %v1890_v22 = vpop.eup %1889 }
 0x78b   : > { %v1153_v56 = vmul.f32 %v1890_v22, %v1882_v29  ;;  %1696 = vmatmul.mubr.msk.bf16.vlgmr.msra.gmra.mrb[16].mxu0 %vm768_vm2, %v1157_v54 }
 0x78d   : > { %v1156_v57 = vpack.c.bf16 %v1153_v56, %v1152_v23 }
 0x78f   : > { %1690 = vmatmul.mubr.msk.bf16.vlgmr.msra.gmra.mrb[12].mxu1 %vm768_vm2, %v1156_v57 }
 0x790   : > { %1700 = vmatpush3.bf16.msra.mxu1 %v1849_v58 }
 0x791   : > { %1705 = vmatprep.subr.bf16.mxu1 %v1850_v59 }
 0x85e   : > { %v1245_v60 = vpop.f32.mrb[16].mxu0 }
 0x85f   : > { %v1697_v61 = vpop.f32.mrb[17].mxu0 }
 0x860   : > { %v1248_v62 = vpop.f32.mrb[18].mxu0 }
 0x861   : > { %v1253_v63 = vpack.c.bf16 %v1248_v62, %v1245_v60  ;;  %v1698_v36 = vpop.f32.mrb[19].mxu0 }
 0x862   : > { %v1198_v3 = vpop.f32.mrb[12].mxu1 }
 0x863   : > { %v1691_v37 = vpop.f32.mrb[13].mxu1 }
 0x864   : > { %v1201_v52 = vpop.f32.mrb[14].mxu1 }
 0x865   : > { %v1252_v53 = vpack.c.bf16 %v1201_v52, %v1198_v3  ;;  %v1692_v4 = vpop.f32.mrb[15].mxu1 }
 0x867   : > { %1701 = vmatprep.mubr.msk.bf16.mxu1 %vm768_vm2, %v1252_v53 }
 0x868   : > { %1702 = vmatmul.mubr.msk.bf16.vlgmr.msra.gmra.mrb[16].mxu1 %vm768_vm2, %v1253_v63 }
 0x869   : > { %1706 = vmatpush3.bf16.msra.mxu1 %v1850_v59  ;;  %1707 = vmatprep.mubr.msk.bf16.mxu1 %vm768_vm2, %v1006_v35 }
 0x874   : > { %1708 = vmatmul.mubr.msk.bf16.vlgmr.msra.gmra.mrb[16].mxu1 %vm768_vm2, %v1007_v46 }
 0x947   : > { %v1709_v7 = vpop.f32.mrb[16].mxu1 }
 0x948   : > { %v1384_v8 = vcombine.high %v1709_v7, %v1709_v7  ;;  %v1394_v9 = vadd.f32 %v1709_v7, %v2464_v26  ;;  %v1363_v20 = vpop.f32.mrb[17].mxu1 }
 0x949   : > { %v1382_v48 = vcombine.high %v1363_v20, %v1363_v20  ;;  %v1390_v49 = vadd.f32 %v1363_v20, %v2434_v0  ;;  %v1710_v35 = vpop.f32.mrb[18].mxu1 }
 0x94a   : > { %v1395_v43 = vadd.f32 %v1384_v8, %v2460_v25  ;;  %v1411_v45 = vadd.f32 %v1610_v6, %v1394_v9  ;;  %v1385_v46 = vcombine.high %v1710_v35, %v1710_v35  ;;  %v1396_v21 = vadd.f32 %v1710_v35, %v2484_v39  ;;  %v1366_v11 = vpop.f32.mrb[19].mxu1 }
 0x94b   : > { %v1391_v55 = vadd.f32 %v1382_v48, %v2436_v1  ;;  %v1407_v12 = vadd.f32 %v1610_v6, %v1390_v49  ;;  %v1383_v13 = vcombine.high %v1366_v11, %v1366_v11  ;;  %v1392_v26 = vadd.f32 %v1366_v11, %v2438_v2 }
 0x94c   : > { %v1412_v14 = vadd.f32 %v1405_v10, %v1395_v43  ;;  %v1397_v15 = vadd.f32 %v1385_v46, %v2488_v40  ;;  %v1413_v0 = vadd.f32 %v1610_v6, %v1396_v21 }
 0x94d   : > { %v1408_v16 = vadd.f32 %v1405_v10, %v1391_v55  ;;  %v1423_v17 = vcombine.low %v1407_v12, %v1411_v45  ;;  %v1393_v25 = vadd.f32 %v1383_v13, %v2444_v5  ;;  %v1409_v18 = vadd.f32 %v1610_v6, %v1392_v26 }
 0x94e   : > { %v1414_v1 = vadd.f32 %v1405_v10, %v1397_v15 }
 0x94f   : > { %v1424_v39 = vcombine.low %v1408_v16, %v1412_v14  ;;  %1431 = vst.msk [vmem:[%s383_s7] sm:$0xff] %vm413_vm0, %v1423_v17  ;;  %v1410_v2 = vadd.f32 %v1405_v10, %v1393_v25  ;;  %v1425_v19 = vcombine.low %v1409_v18, %v1413_v0 }
 0x951   : > { %1432 = vst.msk [vmem:[%s383_s7 + $0x8] sm:$0xff] %vm413_vm0, %v1424_v39  ;;  %v1426_v5 = vcombine.low %v1410_v2, %v1414_v1  ;;  %1433 = vst.msk [vmem:[%s383_s7 + $0x10] sm:$0xff] %vm413_vm0, %v1425_v19 }
 0x953   : > { %1434 = vst.msk [vmem:[%s383_s7 + $0x18] sm:$0xff] %vm413_vm0, %v1426_v5 }
 0x954   : > { %2018 = shalt.err (!%p2015_p1)
}
 0x955   : > { %s2019_s15 = scalar_lea.hbm %s2659_s25, 512  ;;  %s2023_s21 = scalar_lea.hbm %s2770_s20, 2048 }
 0x956   : > { %p2020_p2 = scmp.ne.s32.totalorder %s2659_s25, %s2019_s15  ;;  %p2024_p13 = scmp.lt.u32.totalorder %s2659_s25, %s2770_s20 }
 0x957   : > { %p2025_p4 = scmp.lt.u32.totalorder %s2023_s21, %s2019_s15  ;;  %p2027_p6 = scmp.lt.u32.totalorder %s2019_s15, %s2659_s25 }
 0x958   : > { %p2021_p8 = pnand %p2020_p2, %p2348_p3 }
 0x959   : > { %p2026_p9 = por %p2025_p4, %p2024_p13 }
 0x95a   : > { %p2022_p12 = pneg %p2021_p8 }
 0x95b   : > { %p2028_p0 = por %p2027_p6, %p2026_p9 }
 0x95d   : > { %p2029_p10 = pnand %p2028_p0, %p2022_p12 }
 0x95f   : > { %2032 = shalt.err (!%p2029_p10)
}
 0x960   : > { %s2131_s7 = smov 128   ;;  %s2132_s14 = smov 8  }
 0x961   : > { %1729 = dma.vmem_to_hbm [thread:$0]  (%p2348_p3), %s2661_s8, 512, %s2659_s25, %s1436_s26, %s2131_s7, %s2131_s7, %s2132_s14  }
 0x962 PF: > { %s2771_s13 = sld [smem:[#allocation15_spill]]  ;;  %s2772_s16 = sld [smem:[#allocation18_spill]] }
 0x963   : > { %p1756_p5 = scmp.ge.s32.totalorder %s2111_s12, 2 }
 0x968   : > { %s1466_s27 = sand.u32 1, %s2771_s13   ;;  %p2773_p7 = scmp.ne.s32.totalorder %s2772_s16, 0 }
 0x969   : > { %s1467_s4 = scalar_lea.sflag [#allocation4], %s1466_s27 }
 0x96a   : > { %p1746_p11 = pnand %p1756_p5, %p2773_p7 }
 0x96c   : > { %2078 = dma.done.wait (!%p1746_p11), %s1467_s4, 512  }
 0x96d   : > { %2080 = vsyncadd (!%p1746_p11), %s1467_s4, 4294966784  ;;  %s26_s12 = sadd.s32 1, %s2111_s12   ;;  %s2774_s27 = smov %s2087_s28 }
 0x96e   : > { %p23_p1 = scmp.ge.s32.totalorder %s26_s12, 6   ;;  %s2775_s28 = smov %s2091_s29 }
 0x96f   : > { %s2776_s29 = smov %s2365_s30  ;;  %s2777_s30 = smov %s2103_s10 }
 0x970   : > { %s2778_s9 = smov %s2107_s11  ;;  %s2779_s10 = smov %s2782_s5 }
 0x971   : > { %s2780_s11 = smov %s2786_s6  ;;  %25 = sbr.rel (!%p23_p1) target bundleno = 16 (0x10), region = 109 }
 0x978   :  { %1472 = vsyncpa [#allocation3], 1 }
 0x979   :  { %1474 = vsyncpa [#allocation3 + $0x1], 1 }
 0x97a   :  { %1475 = vsyncpa [#allocation6], 1 }
 0x97b   :  { %1476 = vsyncpa [#allocation9], 1 }
 0x97c   :  { %1477 = vsyncpa [#allocation4], 1 }
 0x97d   :  { %1479 = vsyncpa [#allocation4 + $0x1], 1 }

</bundles_post_ra>
